<compile_context>
chip_gen: v7x
topology: tpu7x:2x2x1
jax: 0.10.0
libtpu: 0.0.40
codegen_flags: <defaults>
</compile_context>

<pallas_src>
import jax
import jax.numpy as jnp
from jax.experimental import pallas as pl
from jax.experimental.pallas import tpu as pltpu


def _round_up(x, m):
    return ((x + m - 1) // m) * m


def _make_kernel(num_layers: int, with_next_obs: bool, matmul_dtype):
    """Kernel over one batch tile; ensemble packed on the lane axis."""

    def kernel(*refs):
        x_ref = refs[0]
        out_ref = refs[-1]
        if with_next_obs:
            sel_ref = refs[-2]
            param_refs = refs[1:-2]      # interleaved (W0, b0, W1, b1, ..., Wout, bout)
        else:
            param_refs = refs[1:-1]

        x0 = x_ref[...]                  # [TB, d_in] f32 (shared across ensembles)
        x = x0

        # Backbone layers: lane-dense MXU matmul + f32 bias + f32 Swish.
        for li in range(num_layers - 1):
            w = param_refs[2 * li][...]
            b = param_refs[2 * li + 1][...]
            h = jnp.dot(x.astype(matmul_dtype), w,
                        preferred_element_type=jnp.float32) + b
            x = h * jax.nn.sigmoid(h)    # Swish (VPU + EUP), kept f32 (v5e-safe)

        # Output layer (no activation).
        w = param_refs[-2][...]
        b = param_refs[-1][...]
        out = jnp.dot(x.astype(matmul_dtype), w,
                      preferred_element_type=jnp.float32) + b

        if with_next_obs:
            # Residual: scatter the obs columns of the (already streamed) input
            # into the next_obs slots of every ensemble block via a 0/1
            # selector matmul.  f32 * {0,1} selection is exact.
            out = out + jnp.dot(x0, sel_ref[...],
                                preferred_element_type=jnp.float32)

        out_ref[...] = out.astype(out_ref.dtype)

    return kernel


def ensemble_dynamics_forward(obs_act, weights, biases, *, obs_dim,
                              with_next_obs, block_b=None,
                              matmul_dtype=jnp.float32):
    """Run the ensemble dynamics MLP via a single pallas_call.

    obs_act : [B, obs_dim + action_dim] float32
    weights : list of [E, in, out] float32 (backbones + output layer)
    biases  : list of [E, 1, out]  float32
    returns : [E, B, out_dim] float32
    """
    assert len(weights) == len(biases)
    num_layers = len(weights)
    E, d_in0, _ = weights[0].shape
    B, d_in = obs_act.shape
    assert d_in == d_in0
    d_out = int(weights[-1].shape[-1])   # 1 + obs_dim if with_next_obs else 1

    f32 = jnp.float32
    LANE = 128
    obs_act = obs_act.astype(f32)

    # ---- Wrapper-side (XLA) packing --------------------------------------
    out_dims = [int(w.shape[-1]) for w in weights]
    packed = [_round_up(E * o, LANE) for o in out_dims]   # lane-dense packed widths
    P_out = packed[-1]

    # Layer 0: shared input -> horizontally stacked weight [d_in, E*H0].
    w0 = weights[0].astype(f32).transpose(1, 0, 2).reshape(d_in, E * out_dims[0])
    w0 = jnp.pad(w0, ((0, 0), (0, packed[0] - E * out_dims[0])))
    packed_ws = [w0]

    # Layers 1..: block-diagonal lane packing, zero-padded to lane-dense widths.
    for l in range(1, num_layers):
        w = weights[l].astype(f32)
        _, din, dout = w.shape
        eye = jnp.eye(E, dtype=f32)
        wbd = jnp.einsum("eio,ef->eifo", w, eye).reshape(E * din, E * dout)
        wbd = jnp.pad(wbd, ((0, packed[l - 1] - E * din),
                            (0, packed[l] - E * dout)))
        packed_ws.append(wbd)

    packed_bs = []
    for l in range(num_layers):
        b = biases[l].astype(f32).reshape(1, E * out_dims[l])
        packed_bs.append(jnp.pad(b, ((0, 0), (0, packed[l] - E * out_dims[l]))))

    if matmul_dtype != jnp.float32:
        packed_ws = [w.astype(matmul_dtype) for w in packed_ws]   # halve weight DMA

    sel = None
    if with_next_obs:
        # sel[j, e*d_out + 1 + j] = 1 for j < obs_dim, all ensembles e.
        sel = jnp.zeros((d_in, P_out), f32)
        cols = (jnp.arange(obs_dim)[None, :] + 1
                + d_out * jnp.arange(E)[:, None]).reshape(-1)
        rows = jnp.tile(jnp.arange(obs_dim), E)
        sel = sel.at[rows, cols].set(1.0)

    # ---- Batch tiling ------------------------------------------------------
    if block_b is None:
        block_b = 1024          # ~1 KB streamed per row -> big tiles amortise overhead
    block_b = _round_up(max(8, min(int(block_b), _round_up(B, 8))), 8)
    B_pad = _round_up(B, block_b)
    # v7x has 2 TensorCores: keep >= 2 'parallel' tiles for large batches.
    if B_pad // block_b < 2 and block_b >= 256:
        block_b = _round_up(block_b // 2, 8)
        B_pad = _round_up(B, block_b)

    x = obs_act
    if B_pad != B:
        x = jnp.pad(x, ((0, B_pad - B), (0, 0)))

    grid = (B_pad // block_b,)
    kernel = _make_kernel(num_layers, with_next_obs, matmul_dtype)

    args = [x]
    for wl, bl in zip(packed_ws, packed_bs):
        args += [wl, bl]
    if with_next_obs:
        args.append(sel)

    out_specs = pl.BlockSpec((block_b, P_out), lambda i: (i, 0))

    # Explicit VMEM budget: single-buffered params + double-buffered IO tiles
    # + headroom for live activations.  Capped at 64 MiB (v7x VMEM).
    itemsize = jnp.dtype(matmul_dtype).itemsize
    param_bytes = sum(int(w.size) * itemsize for w in packed_ws)
    param_bytes += sum(int(b.size) * 4 for b in packed_bs)
    if with_next_obs:
        param_bytes += int(sel.size) * 4
    io_bytes = 2 * block_b * (d_in + P_out) * 4
    act_bytes = 4 * block_b * max(packed) * 4
    vmem_limit = int(min(64 << 20,
                         max(16 << 20, 2 * (param_bytes + io_bytes + act_bytes))))

    def build_specs(buffer_weights_once):
        kw = dict(pipeline_mode=pl.Buffered(1)) if buffer_weights_once else {}
        in_specs = [pl.BlockSpec((block_b, d_in), lambda i: (i, 0))]
        for wl, bl in zip(packed_ws, packed_bs):
            in_specs.append(pl.BlockSpec(wl.shape, lambda i: (0, 0), **kw))
            in_specs.append(pl.BlockSpec(bl.shape, lambda i: (0, 0), **kw))
        if with_next_obs:
            in_specs.append(pl.BlockSpec(sel.shape, lambda i: (0, 0), **kw))
        return in_specs

    def run(buffer_weights_once):
        return pl.pallas_call(
            kernel,
            out_shape=jax.ShapeDtypeStruct((B_pad, P_out), jnp.float32),
            grid_spec=pltpu.PrefetchScalarGridSpec(
                num_scalar_prefetch=0,
                grid=grid,
                in_specs=build_specs(buffer_weights_once),
                out_specs=out_specs,
            ),
            compiler_params=pltpu.CompilerParams(
                dimension_semantics=("parallel",),
                vmem_limit_bytes=vmem_limit,
            ),
        )(*args)

    try:
        out_flat = run(True)       # weights single-buffered (constant index_map)
    except Exception:
        out_flat = run(False)      # fallback if Buffered(1) is unsupported here

    # [B_pad, P_out] -> [E, B, d_out]
    out = out_flat[:B, :E * d_out].reshape(B, E, d_out).transpose(1, 0, 2)
    return out


def reference_forward(obs_act, weights, biases, *, obs_dim, with_next_obs):
    """Pure-JAX reference matching the PyTorch forward."""
    x = jnp.einsum("ij,bjk->bik", obs_act, weights[0]) + biases[0]
    x = x * jax.nn.sigmoid(x)
    for w, b in zip(weights[1:-1], biases[1:-1]):
        x = jnp.einsum("bij,bjk->bik", x, w) + b
        x = x * jax.nn.sigmoid(x)
    out = jnp.einsum("bij,bjk->bik", x, weights[-1]) + biases[-1]
    if with_next_obs:
        reward = out[..., :1]
        next_obs = out[..., 1:] + obs_act[None, :, :obs_dim]
        out = jnp.concatenate([reward, next_obs], axis=-1)
    return out


def init_params(key, obs_dim, action_dim, hidden_dims, num_ensemble, with_next_obs):
    """Matches EnsembleLinear.__init__ shapes:
       weight [E, in, out] ~ trunc_normal(std=1/(2*sqrt(in))), bias [E, 1, out] = 0."""
    dims = [obs_dim + action_dim] + list(hidden_dims)
    out_dim = 1 + obs_dim if with_next_obs else 1
    layer_dims = list(zip(dims[:-1], dims[1:])) + [(dims[-1], out_dim)]
    weights, biases = [], []
    for (din, dout) in layer_dims:
        key, sub = jax.random.split(key)
        std = 1.0 / (2.0 * (din ** 0.5))
        w = jax.random.truncated_normal(sub, -2.0, 2.0, (num_ensemble, din, dout),
                                        dtype=jnp.float32) * std
        b = jnp.zeros((num_ensemble, 1, dout), dtype=jnp.float32)
        weights.append(w)
        biases.append(b)
    return weights, biases


if __name__ == "__main__":
    # Small, module-consistent shapes.
    obs_dim = 12
    action_dim = 4
    hidden_dims = (32, 32)
    num_ensemble = 7
    with_next_obs = True
    batch = 8

    key = jax.random.PRNGKey(0)
    key, k_in = jax.random.split(key)
    obs_act = jax.random.normal(k_in, (batch, obs_dim + action_dim), dtype=jnp.float32)

    weights, biases = init_params(key, obs_dim, action_dim, hidden_dims,
                                  num_ensemble, with_next_obs)

    ref = reference_forward(obs_act, weights, biases,
                            obs_dim=obs_dim, with_next_obs=with_next_obs)
    ref = jax.block_until_ready(ref)

    # f32 MXU-operand path.
    out = ensemble_dynamics_forward(obs_act, weights, biases,
                                    obs_dim=obs_dim, with_next_obs=with_next_obs)
    out = jax.block_until_ready(out)
    assert out.shape == (num_ensemble, batch, 1 + obs_dim), out.shape
    err = float(jnp.max(jnp.abs(out - ref)))
    assert err < 2e-2, f"f32 path max abs err {err}"

    # bf16 MXU-operand path (bias/Swish stay f32); looser tolerance.
    out_bf16 = ensemble_dynamics_forward(obs_act, weights, biases,
                                         obs_dim=obs_dim,
                                         with_next_obs=with_next_obs,
                                         matmul_dtype=jnp.bfloat16)
    out_bf16 = jax.block_until_ready(out_bf16)
    err_bf16 = float(jnp.max(jnp.abs(out_bf16 - ref)))
    assert err_bf16 < 8e-2, f"bf16 path max abs err {err_bf16}"

    print("KERNEL_OK")
</pallas_src>

<mosaic_0001>
module attributes {stable_mosaic.version = 11 : i64} {
  func.func @kernel(%arg0: i32, %arg1: memref<8x16xf32, #tpu.memory_space<vmem>>, %arg2: memref<16x256xf32, #tpu.memory_space<vmem>>, %arg3: memref<1x256xf32, #tpu.memory_space<vmem>>, %arg4: memref<256x256xf32, #tpu.memory_space<vmem>>, %arg5: memref<1x256xf32, #tpu.memory_space<vmem>>, %arg6: memref<256x128xf32, #tpu.memory_space<vmem>>, %arg7: memref<1x128xf32, #tpu.memory_space<vmem>>, %arg8: memref<16x128xf32, #tpu.memory_space<vmem>>, %arg9: memref<8x128xf32, #tpu.memory_space<vmem>>) attributes {dimension_semantics = [#tpu.dimension_semantics<parallel>], iteration_bounds = array<i64: 1>, scalar_prefetch = 0 : i64, scratch_operands = 0 : i64, tpu.core_type = #tpu.core_type<tc>, window_params = [{transform_indices = @transform_0, window_bounds = array<i64: 8, 16>}, {pipeline_mode = #tpu.pipeline_mode<synchronous>, transform_indices = @transform_1, window_bounds = array<i64: 16, 256>}, {pipeline_mode = #tpu.pipeline_mode<synchronous>, transform_indices = @transform_2, window_bounds = array<i64: 1, 256>}, {pipeline_mode = #tpu.pipeline_mode<synchronous>, transform_indices = @transform_3, window_bounds = array<i64: 256, 256>}, {pipeline_mode = #tpu.pipeline_mode<synchronous>, transform_indices = @transform_4, window_bounds = array<i64: 1, 256>}, {pipeline_mode = #tpu.pipeline_mode<synchronous>, transform_indices = @transform_5, window_bounds = array<i64: 256, 128>}, {pipeline_mode = #tpu.pipeline_mode<synchronous>, transform_indices = @transform_6, window_bounds = array<i64: 1, 128>}, {pipeline_mode = #tpu.pipeline_mode<synchronous>, transform_indices = @transform_7, window_bounds = array<i64: 16, 128>}, {transform_indices = @transform_8, window_bounds = array<i64: 8, 128>}]} {
    %c0 = arith.constant 0 : index
    %c0_0 = arith.constant 0 : index
    %0 = vector.load %arg1[%c0, %c0_0] : memref<8x16xf32, #tpu.memory_space<vmem>>, vector<8x16xf32>
    %c0_1 = arith.constant 0 : index
    %c0_2 = arith.constant 0 : index
    %1 = vector.load %arg2[%c0_1, %c0_2] : memref<16x256xf32, #tpu.memory_space<vmem>>, vector<16x256xf32>
    %c0_3 = arith.constant 0 : index
    %c0_4 = arith.constant 0 : index
    %2 = vector.load %arg3[%c0_3, %c0_4] : memref<1x256xf32, #tpu.memory_space<vmem>>, vector<1x256xf32>
    %cst = arith.constant dense<0.000000e+00> : vector<8x256xf32>
    %3 = tpu.matmul %0, %1, %cst {dimension_numbers = #tpu.dot_dimension_numbers<[1], [0], [0], [1], [0, 0, 1, 1], [], []>} : vector<8x16xf32>, vector<16x256xf32>, vector<8x256xf32> -> vector<8x256xf32>
    %4 = vector.broadcast %2 : vector<1x256xf32> to vector<8x256xf32>
    %5 = arith.addf %3, %4 : vector<8x256xf32>
    %6 = arith.negf %5 : vector<8x256xf32>
    %7 = math.exp %6 : vector<8x256xf32>
    %cst_5 = arith.constant 1.000000e+00 : f32
    %8 = vector.broadcast %cst_5 : f32 to vector<8x256xf32>
    %9 = arith.addf %8, %7 : vector<8x256xf32>
    %10 = arith.divf %8, %9 : vector<8x256xf32>
    %11 = arith.mulf %5, %10 : vector<8x256xf32>
    %c0_6 = arith.constant 0 : index
    %c0_7 = arith.constant 0 : index
    %12 = vector.load %arg4[%c0_6, %c0_7] : memref<256x256xf32, #tpu.memory_space<vmem>>, vector<256x256xf32>
    %c0_8 = arith.constant 0 : index
    %c0_9 = arith.constant 0 : index
    %13 = vector.load %arg5[%c0_8, %c0_9] : memref<1x256xf32, #tpu.memory_space<vmem>>, vector<1x256xf32>
    %cst_10 = arith.constant dense<0.000000e+00> : vector<8x256xf32>
    %14 = tpu.matmul %11, %12, %cst_10 {dimension_numbers = #tpu.dot_dimension_numbers<[1], [0], [0], [1], [0, 0, 1, 1], [], []>} : vector<8x256xf32>, vector<256x256xf32>, vector<8x256xf32> -> vector<8x256xf32>
    %15 = vector.broadcast %13 : vector<1x256xf32> to vector<8x256xf32>
    %16 = arith.addf %14, %15 : vector<8x256xf32>
    %17 = arith.negf %16 : vector<8x256xf32>
    %18 = math.exp %17 : vector<8x256xf32>
    %cst_11 = arith.constant 1.000000e+00 : f32
    %19 = vector.broadcast %cst_11 : f32 to vector<8x256xf32>
    %20 = arith.addf %19, %18 : vector<8x256xf32>
    %21 = arith.divf %19, %20 : vector<8x256xf32>
    %22 = arith.mulf %16, %21 : vector<8x256xf32>
    %c0_12 = arith.constant 0 : index
    %c0_13 = arith.constant 0 : index
    %23 = vector.load %arg6[%c0_12, %c0_13] : memref<256x128xf32, #tpu.memory_space<vmem>>, vector<256x128xf32>
    %c0_14 = arith.constant 0 : index
    %c0_15 = arith.constant 0 : index
    %24 = vector.load %arg7[%c0_14, %c0_15] : memref<1x128xf32, #tpu.memory_space<vmem>>, vector<1x128xf32>
    %cst_16 = arith.constant dense<0.000000e+00> : vector<8x128xf32>
    %25 = tpu.matmul %22, %23, %cst_16 {dimension_numbers = #tpu.dot_dimension_numbers<[1], [0], [0], [1], [0, 0, 1, 1], [], []>} : vector<8x256xf32>, vector<256x128xf32>, vector<8x128xf32> -> vector<8x128xf32>
    %26 = vector.broadcast %24 : vector<1x128xf32> to vector<8x128xf32>
    %27 = arith.addf %25, %26 : vector<8x128xf32>
    %c0_17 = arith.constant 0 : index
    %c0_18 = arith.constant 0 : index
    %28 = vector.load %arg8[%c0_17, %c0_18] : memref<16x128xf32, #tpu.memory_space<vmem>>, vector<16x128xf32>
    %cst_19 = arith.constant dense<0.000000e+00> : vector<8x128xf32>
    %29 = tpu.matmul %0, %28, %cst_19 {dimension_numbers = #tpu.dot_dimension_numbers<[1], [0], [0], [1], [0, 0, 1, 1], [], []>} : vector<8x16xf32>, vector<16x128xf32>, vector<8x128xf32> -> vector<8x128xf32>
    %30 = arith.addf %27, %29 : vector<8x128xf32>
    %c0_20 = arith.constant 0 : index
    %c0_21 = arith.constant 0 : index
    %31 = vector.load %arg9[%c0_20, %c0_21] : memref<8x128xf32, #tpu.memory_space<vmem>>, vector<8x128xf32>
    tpu.vector_store %arg9[%c0_20, %c0_21], %30 {strides = array<i32>} : memref<8x128xf32, #tpu.memory_space<vmem>>, vector<8x128xf32>,
    return
  }
  func.func @transform_0(%arg0: i32) -> (i32, i32) {
    %c0_i32 = arith.constant 0 : i32
    %c0_i32_0 = arith.constant 0 : i32
    return %arg0, %c0_i32 : i32, i32
  }
  func.func @transform_1(%arg0: i32) -> (i32, i32) {
    %c0_i32 = arith.constant 0 : i32
    %c0_i32_0 = arith.constant 0 : i32
    %c0_i32_1 = arith.constant 0 : i32
    return %c0_i32, %c0_i32_0 : i32, i32
  }
  func.func @transform_2(%arg0: i32) -> (i32, i32) {
    %c0_i32 = arith.constant 0 : i32
    %c0_i32_0 = arith.constant 0 : i32
    %c0_i32_1 = arith.constant 0 : i32
    return %c0_i32, %c0_i32_0 : i32, i32
  }
  func.func @transform_3(%arg0: i32) -> (i32, i32) {
    %c0_i32 = arith.constant 0 : i32
    %c0_i32_0 = arith.constant 0 : i32
    %c0_i32_1 = arith.constant 0 : i32
    return %c0_i32, %c0_i32_0 : i32, i32
  }
  func.func @transform_4(%arg0: i32) -> (i32, i32) {
    %c0_i32 = arith.constant 0 : i32
    %c0_i32_0 = arith.constant 0 : i32
    %c0_i32_1 = arith.constant 0 : i32
    return %c0_i32, %c0_i32_0 : i32, i32
  }
  func.func @transform_5(%arg0: i32) -> (i32, i32) {
    %c0_i32 = arith.constant 0 : i32
    %c0_i32_0 = arith.constant 0 : i32
    %c0_i32_1 = arith.constant 0 : i32
    return %c0_i32, %c0_i32_0 : i32, i32
  }
  func.func @transform_6(%arg0: i32) -> (i32, i32) {
    %c0_i32 = arith.constant 0 : i32
    %c0_i32_0 = arith.constant 0 : i32
    %c0_i32_1 = arith.constant 0 : i32
    return %c0_i32, %c0_i32_0 : i32, i32
  }
  func.func @transform_7(%arg0: i32) -> (i32, i32) {
    %c0_i32 = arith.constant 0 : i32
    %c0_i32_0 = arith.constant 0 : i32
    %c0_i32_1 = arith.constant 0 : i32
    return %c0_i32, %c0_i32_0 : i32, i32
  }
  func.func @transform_8(%arg0: i32) -> (i32, i32) {
    %c0_i32 = arith.constant 0 : i32
    %c0_i32_0 = arith.constant 0 : i32
    return %arg0, %c0_i32 : i32, i32
  }
}

module attributes {stable_mosaic.version = 11 : i64} {
  func.func @kernel(%arg0: i32, %arg1: memref<8x16xf32, #tpu.memory_space<vmem>>, %arg2: memref<16x256xf32, #tpu.memory_space<vmem>>, %arg3: memref<1x256xf32, #tpu.memory_space<vmem>>, %arg4: memref<256x256xf32, #tpu.memory_space<vmem>>, %arg5: memref<1x256xf32, #tpu.memory_space<vmem>>, %arg6: memref<256x128xf32, #tpu.memory_space<vmem>>, %arg7: memref<1x128xf32, #tpu.memory_space<vmem>>, %arg8: memref<16x128xf32, #tpu.memory_space<vmem>>, %arg9: memref<8x128xf32, #tpu.memory_space<vmem>>) attributes {dimension_semantics = [#tpu.dimension_semantics<parallel>], iteration_bounds = array<i64: 1>, scalar_prefetch = 0 : i64, scratch_operands = 0 : i64, tpu.core_type = #tpu.core_type<tc>, window_params = [{transform_indices = @transform_0, window_bounds = array<i64: 8, 16>}, {pipeline_mode = #tpu.pipeline_mode<synchronous>, transform_indices = @transform_1, window_bounds = array<i64: 16, 256>}, {pipeline_mode = #tpu.pipeline_mode<synchronous>, transform_indices = @transform_2, window_bounds = array<i64: 1, 256>}, {pipeline_mode = #tpu.pipeline_mode<synchronous>, transform_indices = @transform_3, window_bounds = array<i64: 256, 256>}, {pipeline_mode = #tpu.pipeline_mode<synchronous>, transform_indices = @transform_4, window_bounds = array<i64: 1, 256>}, {pipeline_mode = #tpu.pipeline_mode<synchronous>, transform_indices = @transform_5, window_bounds = array<i64: 256, 128>}, {pipeline_mode = #tpu.pipeline_mode<synchronous>, transform_indices = @transform_6, window_bounds = array<i64: 1, 128>}, {pipeline_mode = #tpu.pipeline_mode<synchronous>, transform_indices = @transform_7, window_bounds = array<i64: 16, 128>}, {transform_indices = @transform_8, window_bounds = array<i64: 8, 128>}]} {
    %c0 = arith.constant 0 : index
    %c0_0 = arith.constant 0 : index
    %0 = vector.load %arg1[%c0, %c0_0] : memref<8x16xf32, #tpu.memory_space<vmem>>, vector<8x16xf32>
    %c0_1 = arith.constant 0 : index
    %c0_2 = arith.constant 0 : index
    %1 = vector.load %arg2[%c0_1, %c0_2] : memref<16x256xf32, #tpu.memory_space<vmem>>, vector<16x256xf32>
    %c0_3 = arith.constant 0 : index
    %c0_4 = arith.constant 0 : index
    %2 = vector.load %arg3[%c0_3, %c0_4] : memref<1x256xf32, #tpu.memory_space<vmem>>, vector<1x256xf32>
    %cst = arith.constant dense<0.000000e+00> : vector<8x256xf32>
    %3 = tpu.matmul %0, %1, %cst {dimension_numbers = #tpu.dot_dimension_numbers<[1], [0], [0], [1], [0, 0, 1, 1], [], []>} : vector<8x16xf32>, vector<16x256xf32>, vector<8x256xf32> -> vector<8x256xf32>
    %4 = vector.broadcast %2 : vector<1x256xf32> to vector<8x256xf32>
    %5 = arith.addf %3, %4 : vector<8x256xf32>
    %6 = arith.negf %5 : vector<8x256xf32>
    %7 = math.exp %6 : vector<8x256xf32>
    %cst_5 = arith.constant 1.000000e+00 : f32
    %8 = vector.broadcast %cst_5 : f32 to vector<8x256xf32>
    %9 = arith.addf %8, %7 : vector<8x256xf32>
    %10 = arith.divf %8, %9 : vector<8x256xf32>
    %11 = arith.mulf %5, %10 : vector<8x256xf32>
    %c0_6 = arith.constant 0 : index
    %c0_7 = arith.constant 0 : index
    %12 = vector.load %arg4[%c0_6, %c0_7] : memref<256x256xf32, #tpu.memory_space<vmem>>, vector<256x256xf32>
    %c0_8 = arith.constant 0 : index
    %c0_9 = arith.constant 0 : index
    %13 = vector.load %arg5[%c0_8, %c0_9] : memref<1x256xf32, #tpu.memory_space<vmem>>, vector<1x256xf32>
    %cst_10 = arith.constant dense<0.000000e+00> : vector<8x256xf32>
    %14 = tpu.matmul %11, %12, %cst_10 {dimension_numbers = #tpu.dot_dimension_numbers<[1], [0], [0], [1], [0, 0, 1, 1], [], []>} : vector<8x256xf32>, vector<256x256xf32>, vector<8x256xf32> -> vector<8x256xf32>
    %15 = vector.broadcast %13 : vector<1x256xf32> to vector<8x256xf32>
    %16 = arith.addf %14, %15 : vector<8x256xf32>
    %17 = arith.negf %16 : vector<8x256xf32>
    %18 = math.exp %17 : vector<8x256xf32>
    %cst_11 = arith.constant 1.000000e+00 : f32
    %19 = vector.broadcast %cst_11 : f32 to vector<8x256xf32>
    %20 = arith.addf %19, %18 : vector<8x256xf32>
    %21 = arith.divf %19, %20 : vector<8x256xf32>
    %22 = arith.mulf %16, %21 : vector<8x256xf32>
    %c0_12 = arith.constant 0 : index
    %c0_13 = arith.constant 0 : index
    %23 = vector.load %arg6[%c0_12, %c0_13] : memref<256x128xf32, #tpu.memory_space<vmem>>, vector<256x128xf32>
    %c0_14 = arith.constant 0 : index
    %c0_15 = arith.constant 0 : index
    %24 = vector.load %arg7[%c0_14, %c0_15] : memref<1x128xf32, #tpu.memory_space<vmem>>, vector<1x128xf32>
    %cst_16 = arith.constant dense<0.000000e+00> : vector<8x128xf32>
    %25 = tpu.matmul %22, %23, %cst_16 {dimension_numbers = #tpu.dot_dimension_numbers<[1], [0], [0], [1], [0, 0, 1, 1], [], []>} : vector<8x256xf32>, vector<256x128xf32>, vector<8x128xf32> -> vector<8x128xf32>
    %26 = vector.broadcast %24 : vector<1x128xf32> to vector<8x128xf32>
    %27 = arith.addf %25, %26 : vector<8x128xf32>
    %c0_17 = arith.constant 0 : index
    %c0_18 = arith.constant 0 : index
    %28 = vector.load %arg8[%c0_17, %c0_18] : memref<16x128xf32, #tpu.memory_space<vmem>>, vector<16x128xf32>
    %cst_19 = arith.constant dense<0.000000e+00> : vector<8x128xf32>
    %29 = tpu.matmul %0, %28, %cst_19 {dimension_numbers = #tpu.dot_dimension_numbers<[1], [0], [0], [1], [0, 0, 1, 1], [], []>} : vector<8x16xf32>, vector<16x128xf32>, vector<8x128xf32> -> vector<8x128xf32>
    %30 = arith.addf %27, %29 : vector<8x128xf32>
    %c0_20 = arith.constant 0 : index
    %c0_21 = arith.constant 0 : index
    %31 = vector.load %arg9[%c0_20, %c0_21] : memref<8x128xf32, #tpu.memory_space<vmem>>, vector<8x128xf32>
    tpu.vector_store %arg9[%c0_20, %c0_21], %30 {strides = array<i32>} : memref<8x128xf32, #tpu.memory_space<vmem>>, vector<8x128xf32>,
    return
  }
  func.func @transform_0(%arg0: i32) -> (i32, i32) {
    %c0_i32 = arith.constant 0 : i32
    %c0_i32_0 = arith.constant 0 : i32
    return %arg0, %c0_i32 : i32, i32
  }
  func.func @transform_1(%arg0: i32) -> (i32, i32) {
    %c0_i32 = arith.constant 0 : i32
    %c0_i32_0 = arith.constant 0 : i32
    %c0_i32_1 = arith.constant 0 : i32
    return %c0_i32, %c0_i32_0 : i32, i32
  }
  func.func @transform_2(%arg0: i32) -> (i32, i32) {
    %c0_i32 = arith.constant 0 : i32
    %c0_i32_0 = arith.constant 0 : i32
    %c0_i32_1 = arith.constant 0 : i32
    return %c0_i32, %c0_i32_0 : i32, i32
  }
  func.func @transform_3(%arg0: i32) -> (i32, i32) {
    %c0_i32 = arith.constant 0 : i32
    %c0_i32_0 = arith.constant 0 : i32
    %c0_i32_1 = arith.constant 0 : i32
    return %c0_i32, %c0_i32_0 : i32, i32
  }
  func.func @transform_4(%arg0: i32) -> (i32, i32) {
    %c0_i32 = arith.constant 0 : i32
    %c0_i32_0 = arith.constant 0 : i32
    %c0_i32_1 = arith.constant 0 : i32
    return %c0_i32, %c0_i32_0 : i32, i32
  }
  func.func @transform_5(%arg0: i32) -> (i32, i32) {
    %c0_i32 = arith.constant 0 : i32
    %c0_i32_0 = arith.constant 0 : i32
    %c0_i32_1 = arith.constant 0 : i32
    return %c0_i32, %c0_i32_0 : i32, i32
  }
  func.func @transform_6(%arg0: i32) -> (i32, i32) {
    %c0_i32 = arith.constant 0 : i32
    %c0_i32_0 = arith.constant 0 : i32
    %c0_i32_1 = arith.constant 0 : i32
    return %c0_i32, %c0_i32_0 : i32, i32
  }
  func.func @transform_7(%arg0: i32) -> (i32, i32) {
    %c0_i32 = arith.constant 0 : i32
    %c0_i32_0 = arith.constant 0 : i32
    %c0_i32_1 = arith.constant 0 : i32
    return %c0_i32, %c0_i32_0 : i32, i32
  }
  func.func @transform_8(%arg0: i32) -> (i32, i32) {
    %c0_i32 = arith.constant 0 : i32
    %c0_i32_0 = arith.constant 0 : i32
    return %arg0, %c0_i32 : i32, i32
  }
}

</mosaic_0001>

<bundles_post_ra>
// kernel: tpu_custom_call.1
= control target key start
LH: loop header
LB: loop body
LE: loop exit
PB: predicated region body
PF: predicated region fallthrough
CT: control target
= control target key end

     0   :  { %13 = vsyncpa [#allocation3], 0  ;;  %s1009_s0 = inlined_call_operand.hbm [shape: f32[8,16], index: 0, kind: input, shape index: {}]   ;;  %s1010_s1 = inlined_call_operand.hbm [shape: f32[16,256], index: 1, kind: input, shape index: {}]   ;;  %s1011_s2 = inlined_call_operand.vmem [shape: f32[1,256], index: 2, kind: input, shape index: {}]   ;;  %s1012_s3 = inlined_call_operand.hbm [shape: f32[256,256], index: 3, kind: input, shape index: {}]   ;;  %s1013_s4 = inlined_call_operand.vmem [shape: f32[1,256], index: 4, kind: input, shape index: {}]   ;;  %s1014_s5 = inlined_call_operand.hbm [shape: f32[256,128], index: 5, kind: input, shape index: {}]   ;;  %s1015_s6 = inlined_call_operand.vmem [shape: f32[1,128], index: 6, kind: input, shape index: {}]   ;;  %s1016_s7 = inlined_call_operand.vmem [shape: f32[16,128], index: 7, kind: input, shape index: {}]   ;;  %s1017_s8 = inlined_call_operand.hbm [shape: f32[8,128], index: 8, kind: output, shape index: {}]  }
   0x1   :  { %14 = vsyncpa [#allocation6], 0 }
   0x2   :  { %15 = vsyncpa [#allocation9], 0 }
   0x3   :  { %16 = vsyncpa [#allocation4], 0  ;;  %s851_s27 = smov [#allocation5]   ;;  %s733_s9 = scalar_lea.hbm %s1010_s1, 512 }
   0x4   :  { %s32_s28 = sshll.u32 %s851_s27, 4  ;;  %p734_p0 = scmp.ne.s32.totalorder %s1010_s1, %s733_s9  ;;  %s33_s28 = int_to_ptr.vmem [resolvable:$true] %s32_s28 }
   0x5   :  { %p737_p1 = scmp.lt.u32.totalorder %s733_s9, %s1010_s1 }
   0x7   :  { %p739_p2 = pnand %p737_p1, %p734_p0 }
   0x9   :  { %742 = shalt.err (!%p739_p2)
}
   0xa   :  { %s743_s14 = scalar_lea.vmem %s33_s28, 512  ;;  %p748_p4 = scmp.lt.s32.totalorder %s33_s28, %s33_s28 }
   0xb   :  { %p744_p3 = scmp.ne.s32.totalorder %s33_s28, %s743_s14  ;;  %p749_p5 = scmp.lt.s32.totalorder %s743_s14, %s743_s14 }
   0xd   :  { %p750_p6 = por %p749_p5, %p748_p4 }
   0xf   :  { %p751_p7 = pnand %p750_p6, %p744_p3 }
  0x11   :  { %754 = shalt.err (!%p751_p7)
}
  0x12   :  { %s852_s15 = smov 256   ;;  %s853_s16 = smov 16  }
  0x13   :  { %38 = dma.hbm_to_vmem [thread:$0]  %s1010_s1, 512, %s33_s28, [#allocation6], %s852_s15, %s852_s15, %s853_s16  }
  0x14   :  { %s854_s19 = smov [#allocation2]   ;;  %s855_s21 = smov [#allocation7]  }
  0x15   :  { %s23_s20 = sshll.u32 %s854_s19, 4  ;;  %s46_s22 = sshll.u32 %s855_s21, 4  ;;  %s24_s20 = int_to_ptr.vmem [resolvable:$true] %s23_s20  ;;  %s47_s22 = int_to_ptr.vmem [resolvable:$true] %s46_s22 }
  0x16   :  { %s755_s25 = scalar_lea.hbm %s1009_s0, 128 }
  0x17   :  { %p756_p8 = scmp.ne.s32.totalorder %s1009_s0, %s755_s25  ;;  %p759_p9 = scmp.lt.u32.totalorder %s755_s25, %s1009_s0 }
  0x19   :  { %p761_p10 = pnand %p759_p9, %p756_p8 }
  0x1b   :  { %764 = shalt.err (!%p761_p10)
}
  0x1c   :  { %s765_s1 = scalar_lea.vmem %s24_s20, 128  ;;  %p770_p12 = scmp.lt.s32.totalorder %s24_s20, %s24_s20 }
  0x1d   :  { %p766_p11 = scmp.ne.s32.totalorder %s24_s20, %s765_s1  ;;  %p771_p13 = scmp.lt.s32.totalorder %s765_s1, %s765_s1 }
  0x1f   :  { %p772_p0 = por %p771_p13, %p770_p12 }
  0x21   :  { %p773_p1 = pnand %p772_p0, %p766_p11 }
  0x23   :  { %776 = shalt.err (!%p773_p1)
}
  0x24   :  { %26 = dma.hbm_to_vmem [thread:$0]  %s1009_s0, 128, %s24_s20, [#allocation3]  }
  0x25   :  { %s777_s12 = scalar_lea.hbm %s1012_s3, 8192 }
  0x26   :  { %p778_p2 = scmp.ne.s32.totalorder %s1012_s3, %s777_s12  ;;  %p781_p3 = scmp.lt.u32.totalorder %s777_s12, %s1012_s3 }
  0x28   :  { %p783_p4 = pnand %p781_p3, %p778_p2 }
  0x2a   :  { %786 = shalt.err (!%p783_p4)
}
  0x2b   :  { %s787_s19 = scalar_lea.vmem %s47_s22, 8192  ;;  %p792_p6 = scmp.lt.s32.totalorder %s47_s22, %s47_s22 }
  0x2c   :  { %p788_p5 = scmp.ne.s32.totalorder %s47_s22, %s787_s19  ;;  %p793_p7 = scmp.lt.s32.totalorder %s787_s19, %s787_s19 }
  0x2e   :  { %p794_p8 = por %p793_p7, %p792_p6 }
  0x30   :  { %p795_p9 = pnand %p794_p8, %p788_p5 }
  0x32   :  { %798 = shalt.err (!%p795_p9)
}
  0x33   :  { %52 = dma.hbm_to_vmem [thread:$0]  %s1012_s3, 8192, %s47_s22, [#allocation6], %s852_s15, %s852_s15, %s853_s16  }
  0x34   :  { %s856_s21 = smov [#allocation8]   ;;  %s799_s26 = scalar_lea.hbm %s1014_s5, 4096 }
  0x35   :  { %s60_s23 = sshll.u32 %s856_s21, 4  ;;  %p800_p10 = scmp.ne.s32.totalorder %s1014_s5, %s799_s26  ;;  %s61_s23 = int_to_ptr.vmem [resolvable:$true] %s60_s23 }
  0x36   :  { %p803_p11 = scmp.lt.u32.totalorder %s799_s26, %s1014_s5 }
  0x38   :  { %p805_p12 = pnand %p803_p11, %p800_p10 }
  0x3a   :  { %808 = shalt.err (!%p805_p12)
}
  0x3b   :  { %s809_s28 = scalar_lea.vmem %s61_s23, 4096  ;;  %p814_p0 = scmp.lt.s32.totalorder %s61_s23, %s61_s23 }
  0x3c   :  { %p810_p13 = scmp.ne.s32.totalorder %s61_s23, %s809_s28  ;;  %p815_p1 = scmp.lt.s32.totalorder %s809_s28, %s809_s28 }
  0x3e   :  { %p816_p2 = por %p815_p1, %p814_p0 }
  0x40   :  { %p817_p3 = pnand %p816_p2, %p810_p13 }
  0x42   :  { %820 = shalt.err (!%p817_p3)
}
  0x43   :  { %s857_s3 = smov 128   ;;  %s858_s15 = smov 8  }
  0x44   :  { %66 = dma.hbm_to_vmem [thread:$0]  %s1014_s5, 4096, %s61_s23, [#allocation9], %s857_s3, %s857_s3, %s858_s15  }
  0x45   :  { %843 = dma.done.wait [#allocation3], 128  }
  0x46   :  { %844 = vsyncadd [#allocation3], 4294967168 }
  0x47   :  { %845 = dma.done.wait [#allocation6], 8704  }
  0x48   :  { %846 = vsyncadd [#allocation6], 4294958592 }
  0x49   :  { %847 = dma.done.wait [#allocation9], 4096  }
  0x4a   :  { %848 = vsyncadd [#allocation9], 4294963200  ;;  %v859_v0 = vmov 0.0   ;;  %v85_v1 = vld [vmem:[#allocation5 + $0x8] sm:$0xff]  ;;  %v87_v2 = vld [vmem:[#allocation5 + $0x18] sm:$0xff]  ;;  %vm100_vm0 = vcmask 130048  }
  0x4b   :  { %168 = vmatprep.mubr.f32.mxu0 %v859_v0  ;;  %v84_v3 = vld [vmem:[#allocation5] sm:$0xff]  ;;  %v602_v4 = vpack.c.bf16 %v87_v2, %v85_v1  ;;  %v86_v5 = vld [vmem:[#allocation5 + $0x10] sm:$0xff]  ;;  %v190_v6 = vld [vmem:[#allocation7 + $0x8] sm:$0xff]  ;;  %vm861_vm1 = vmmov 0  }
  0x4c   :  { %v604_v7 = vpack.c.bf16 %v86_v5, %v84_v3  ;;  %v963_v8 = vld [vmem:[#allocation2] sm:$0xff]  ;;  %v189_v10 = vld [vmem:[#allocation7] sm:$0xff]  ;;  %v191_v11 = vld [vmem:[#allocation7 + $0x10] sm:$0xff] }
  0x4d   :  { %v192_v9 = vld [vmem:[#allocation7 + $0x18] sm:$0xff]  ;;  %603 = vmatprep.subr.bf16.mxu0 %v602_v4  ;;  %v608_v13 = vpack.c.bf16 %v191_v11, %v189_v10  ;;  %v194_v14 = vld [vmem:[#allocation7 + $0x28] sm:$0xff]  ;;  %v193_v16 = vld [vmem:[#allocation7 + $0x20] sm:$0xff] }
  0x4e   :  { %v606_v12 = vpack.c.bf16 %v192_v9, %v190_v6  ;;  %v196_v15 = vld [vmem:[#allocation7 + $0x38] sm:$0xff]  ;;  %605 = vmatpush1.bf16.msra.mxu0 %v604_v7  ;;  %v195_v18 = vld [vmem:[#allocation7 + $0x30] sm:$0xff]  ;;  %v198_v19 = vld [vmem:[#allocation7 + $0x48] sm:$0xff] }
  0x4f   :  { %v610_v17 = vpack.c.bf16 %v196_v15, %v194_v14  ;;  %v200_v20 = vld [vmem:[#allocation7 + $0x58] sm:$0xff]  ;;  %v612_v21 = vpack.c.bf16 %v195_v18, %v193_v16  ;;  %v197_v23 = vld [vmem:[#allocation7 + $0x40] sm:$0xff]  ;;  %v199_v24 = vld [vmem:[#allocation7 + $0x50] sm:$0xff] }
  0x50   :  { %607 = vmatprep.subr.bf16.mxu1 %v606_v12  ;;  %v614_v22 = vpack.c.bf16 %v200_v20, %v198_v19  ;;  %v202_v25 = vld [vmem:[#allocation7 + $0x68] sm:$0xff]  ;;  %v204_v26 = vld [vmem:[#allocation7 + $0x78] sm:$0xff]  ;;  %v616_v27 = vpack.c.bf16 %v199_v24, %v197_v23  ;;  %v201_v29 = vld [vmem:[#allocation7 + $0x60] sm:$0xff] }
  0x51   :  { %609 = vmatpush1.bf16.msra.mxu1 %v608_v13  ;;  %550 = vmatmul.mubr.msk.f32.vlgmr.msra.gmra.mrb[0].mxu0 %vm100_vm0, %v963_v8  ;;  %v618_v28 = vpack.c.bf16 %v204_v26, %v202_v25  ;;  %v203_v30 = vld [vmem:[#allocation7 + $0x70] sm:$0xff]  ;;  %v206_v31 = vld [vmem:[#allocation7 + $0x88] sm:$0xff]  ;;  %v208_v32 = vld [vmem:[#allocation7 + $0x98] sm:$0xff] }
  0x52   :  { %611 = vmatprep.subr.bf16.mxu1 %v610_v17  ;;  %v620_v33 = vpack.c.bf16 %v203_v30, %v201_v29  ;;  %v622_v34 = vpack.c.bf16 %v208_v32, %v206_v31  ;;  %v205_v35 = vld [vmem:[#allocation7 + $0x80] sm:$0xff]  ;;  %v207_v36 = vld [vmem:[#allocation7 + $0x90] sm:$0xff]  ;;  %v210_v37 = vld [vmem:[#allocation7 + $0xa8] sm:$0xff] }
  0x53   :  { %v212_v38 = vld [vmem:[#allocation7 + $0xb8] sm:$0xff]  ;;  %v624_v39 = vpack.c.bf16 %v207_v36, %v205_v35  ;;  %v209_v41 = vld [vmem:[#allocation7 + $0xa0] sm:$0xff]  ;;  %v211_v42 = vld [vmem:[#allocation7 + $0xb0] sm:$0xff] }
  0x54   :  { %v626_v40 = vpack.c.bf16 %v212_v38, %v210_v37  ;;  %v214_v43 = vld [vmem:[#allocation7 + $0xc8] sm:$0xff]  ;;  %v216_v44 = vld [vmem:[#allocation7 + $0xd8] sm:$0xff]  ;;  %v628_v45 = vpack.c.bf16 %v211_v42, %v209_v41  ;;  %v213_v47 = vld [vmem:[#allocation7 + $0xc0] sm:$0xff]  ;;  %v90_v42 = vlaneseq }
  0x55   :  { %613 = vmatpush1.bf16.msra.mxu1 %v612_v21  ;;  %v630_v46 = vpack.c.bf16 %v216_v44, %v214_v43  ;;  %v215_v48 = vld [vmem:[#allocation7 + $0xd0] sm:$0xff]  ;;  %v218_v49 = vld [vmem:[#allocation7 + $0xe8] sm:$0xff]  ;;  %v220_v50 = vld [vmem:[#allocation7 + $0xf8] sm:$0xff] }
  0x56   :  { %615 = vmatprep.subr.bf16.mxu1 %v614_v22  ;;  %v632_v51 = vpack.c.bf16 %v215_v48, %v213_v47  ;;  %v634_v52 = vpack.c.bf16 %v220_v50, %v218_v49  ;;  %v217_v53 = vld [vmem:[#allocation7 + $0xe0] sm:$0xff]  ;;  %v219_v54 = vld [vmem:[#allocation7 + $0xf0] sm:$0xff]  ;;  %v222_v56 = vld [vmem:[#allocation7 + $0x108] sm:$0xff]  ;;  %v967_v43 = vshrl.u32 %v90_v42, 7 }
  0x57   :  { %v636_v55 = vpack.c.bf16 %v219_v54, %v217_v53  ;;  %v224_v57 = vld [vmem:[#allocation7 + $0x118] sm:$0xff]  ;;  %v221_v59 = vld [vmem:[#allocation7 + $0x100] sm:$0xff]  ;;  %v223_v60 = vld [vmem:[#allocation7 + $0x110] sm:$0xff] }
  0x58   :  { %v638_v58 = vpack.c.bf16 %v224_v57, %v222_v56  ;;  %v640_v61 = vpack.c.bf16 %v223_v60, %v221_v59  ;;  %v226_v62 = vld [vmem:[#allocation7 + $0x128] sm:$0xff]  ;;  %v228_v63 = vld [vmem:[#allocation7 + $0x138] sm:$0xff]  ;;  %v225_v2 = vld [vmem:[#allocation7 + $0x120] sm:$0xff]  ;;  %v92_v44 = vsub.s32 0, %v967_v43 }
  0x59   :  { %617 = vmatpush1.bf16.msra.mxu1 %v616_v27  ;;  %v642_v1 = vpack.c.bf16 %v228_v63, %v226_v62  ;;  %v227_v3 = vld [vmem:[#allocation7 + $0x130] sm:$0xff]  ;;  %v230_v5 = vld [vmem:[#allocation7 + $0x148] sm:$0xff]  ;;  %v232_v6 = vld [vmem:[#allocation7 + $0x158] sm:$0xff] }
  0x5a   :  { %619 = vmatprep.subr.bf16.mxu1 %v618_v28  ;;  %v644_v4 = vpack.c.bf16 %v227_v3, %v225_v2  ;;  %v646_v7 = vpack.c.bf16 %v232_v6, %v230_v5  ;;  %v229_v9 = vld [vmem:[#allocation7 + $0x140] sm:$0xff]  ;;  %v231_v10 = vld [vmem:[#allocation7 + $0x150] sm:$0xff]  ;;  %v234_v12 = vld [vmem:[#allocation7 + $0x168] sm:$0xff] }
  0x5b   :  { %v648_v11 = vpack.c.bf16 %v231_v10, %v229_v9  ;;  %v236_v13 = vld [vmem:[#allocation7 + $0x178] sm:$0xff]  ;;  %v233_v15 = vld [vmem:[#allocation7 + $0x160] sm:$0xff]  ;;  %v235_v16 = vld [vmem:[#allocation7 + $0x170] sm:$0xff] }
  0x5c   :  { %v650_v14 = vpack.c.bf16 %v236_v13, %v234_v12  ;;  %v652_v17 = vpack.c.bf16 %v235_v16, %v233_v15  ;;  %v238_v18 = vld [vmem:[#allocation7 + $0x188] sm:$0xff]  ;;  %v240_v19 = vld [vmem:[#allocation7 + $0x198] sm:$0xff]  ;;  %v237_v21 = vld [vmem:[#allocation7 + $0x180] sm:$0xff] }
  0x5d   :  { %621 = vmatpush1.bf16.msra.mxu1 %v620_v33  ;;  %v654_v20 = vpack.c.bf16 %v240_v19, %v238_v18  ;;  %v239_v22 = vld [vmem:[#allocation7 + $0x190] sm:$0xff]  ;;  %v242_v24 = vld [vmem:[#allocation7 + $0x1a8] sm:$0xff]  ;;  %v244_v25 = vld [vmem:[#allocation7 + $0x1b8] sm:$0xff] }
  0x5e   :  { %623 = vmatprep.subr.bf16.mxu1 %v622_v34  ;;  %v656_v23 = vpack.c.bf16 %v239_v22, %v237_v21  ;;  %v658_v26 = vpack.c.bf16 %v244_v25, %v242_v24  ;;  %v241_v27 = vld [vmem:[#allocation7 + $0x1a0] sm:$0xff]  ;;  %v243_v28 = vld [vmem:[#allocation7 + $0x1b0] sm:$0xff]  ;;  %v246_v30 = vld [vmem:[#allocation7 + $0x1c8] sm:$0xff] }
  0x5f   :  { %v660_v29 = vpack.c.bf16 %v243_v28, %v241_v27  ;;  %v248_v31 = vld [vmem:[#allocation7 + $0x1d8] sm:$0xff]  ;;  %v245_v33 = vld [vmem:[#allocation7 + $0x1c0] sm:$0xff]  ;;  %v247_v34 = vld [vmem:[#allocation7 + $0x1d0] sm:$0xff] }
  0x60   :  { %v662_v32 = vpack.c.bf16 %v248_v31, %v246_v30  ;;  %v664_v35 = vpack.c.bf16 %v247_v34, %v245_v33  ;;  %v250_v36 = vld [vmem:[#allocation7 + $0x1e8] sm:$0xff]  ;;  %v252_v37 = vld [vmem:[#allocation7 + $0x1f8] sm:$0xff]  ;;  %v366_v63 = vld [vmem:[#allocation8 + $0x80] sm:$0xff] }
  0x61   :  { %625 = vmatpush1.bf16.msra.mxu1 %v624_v39  ;;  %v666_v38 = vpack.c.bf16 %v252_v37, %v250_v36  ;;  %v249_v39 = vld [vmem:[#allocation7 + $0x1e0] sm:$0xff]  ;;  %v368_v6 = vld [vmem:[#allocation8 + $0x90] sm:$0xff] }
  0x62   :  { %627 = vmatprep.subr.bf16.mxu1 %v626_v40  ;;  %v251_v40 = vld [vmem:[#allocation7 + $0x1f0] sm:$0xff]  ;;  %v350_v3 = vld [vmem:[#allocation8] sm:$0xff] }
  0x63   :  { %v668_v41 = vpack.c.bf16 %v251_v40, %v249_v39  ;;  %v352_v10 = vld [vmem:[#allocation8 + $0x10] sm:$0xff]  ;;  %v370_v13 = vld [vmem:[#allocation8 + $0xa0] sm:$0xff] }
  0x64   :  { %v354_v16 = vld [vmem:[#allocation8 + $0x20] sm:$0xff]  ;;  %v372_v19 = vld [vmem:[#allocation8 + $0xb0] sm:$0xff] }
  0x65   :  { %629 = vmatpush1.bf16.msra.mxu1 %v628_v45  ;;  %v88_v45 = vld [vmem:[%s1011_s2] sm:$0x3]  ;;  %v356_v22 = vld [vmem:[#allocation8 + $0x30] sm:$0xff]  ;;  %v374_v25 = vld [vmem:[#allocation8 + $0xc0] sm:$0xff] }
  0x66   :  { %631 = vmatprep.subr.bf16.mxu1 %v630_v46  ;;  %v96_v46 = vsub.s32 1, %v967_v43  ;;  %v93_v47 = vrot.slane %v88_v45, %v92_v44  ;;  %v358_v28 = vld [vmem:[#allocation8 + $0x40] sm:$0xff]  ;;  %v376_v31 = vld [vmem:[#allocation8 + $0xd0] sm:$0xff] }
  0x67   :  { %v360_v34 = vld [vmem:[#allocation8 + $0x50] sm:$0xff]  ;;  %v378_v37 = vld [vmem:[#allocation8 + $0xe0] sm:$0xff] }
  0x68   :  { %v97_v48 = vrot.slane %v88_v45, %v96_v46  ;;  %v362_v40 = vld [vmem:[#allocation8 + $0x60] sm:$0xff]  ;;  %v380_v45 = vld [vmem:[#allocation8 + $0xf0] sm:$0xff] }
  0x69   :  { %633 = vmatpush1.bf16.msra.mxu1 %v632_v51  ;;  %v460_v43 = vld [vmem:[%s1016_s7 + $0x8] sm:$0xff] }
  0x6a   :  { %635 = vmatprep.subr.bf16.mxu1 %v634_v52 }
  0x6d   :  { %637 = vmatpush1.bf16.msra.mxu1 %v636_v55 }
  0x6e   :  { %639 = vmatprep.subr.bf16.mxu1 %v638_v58 }
  0x71   :  { %641 = vmatpush1.bf16.msra.mxu1 %v640_v61 }
  0x72   :  { %643 = vmatprep.subr.bf16.mxu1 %v642_v1  ;;  %v367_v1 = vld [vmem:[#allocation8 + $0x88] sm:$0xff] }
  0x73   :  { %v670_v2 = vpack.c.bf16 %v367_v1, %v366_v63 }
  0x75   :  { %645 = vmatpush1.bf16.msra.mxu1 %v644_v4  ;;  %v351_v4 = vld [vmem:[#allocation8 + $0x8] sm:$0xff]  ;;  %671 = vmatprep.subr.bf16.mxu0 %v670_v2 }
  0x76   :  { %647 = vmatprep.subr.bf16.mxu1 %v646_v7  ;;  %v672_v5 = vpack.c.bf16 %v351_v4, %v350_v3  ;;  %v369_v7 = vld [vmem:[#allocation8 + $0x98] sm:$0xff] }
  0x77   :  { %v674_v9 = vpack.c.bf16 %v369_v7, %v368_v6 }
  0x78   :  { %673 = vmatpush3.bf16.msra.mxu0 %v672_v5 }
  0x79   :  { %649 = vmatpush1.bf16.msra.mxu1 %v648_v11  ;;  %v353_v11 = vld [vmem:[#allocation8 + $0x18] sm:$0xff]  ;;  %675 = vmatprep.subr.bf16.mxu0 %v674_v9 }
  0x7a   :  { %651 = vmatprep.subr.bf16.mxu1 %v650_v14  ;;  %v676_v12 = vpack.c.bf16 %v353_v11, %v352_v10  ;;  %v371_v14 = vld [vmem:[#allocation8 + $0xa8] sm:$0xff] }
  0x7b   :  { %v678_v15 = vpack.c.bf16 %v371_v14, %v370_v13  ;;  %v555_v10 = vld [vmem:[%s1015_s6] ss:$0 sm:$0xff] }
  0x7c   :  { %677 = vmatpush3.bf16.msra.mxu0 %v676_v12 }
  0x7d   :  { %653 = vmatpush1.bf16.msra.mxu1 %v652_v17  ;;  %v355_v17 = vld [vmem:[#allocation8 + $0x28] sm:$0xff]  ;;  %679 = vmatprep.subr.bf16.mxu0 %v678_v15 }
  0x7e   :  { %655 = vmatprep.subr.bf16.mxu1 %v654_v20  ;;  %v680_v18 = vpack.c.bf16 %v355_v17, %v354_v16  ;;  %v373_v20 = vld [vmem:[#allocation8 + $0xb8] sm:$0xff] }
  0x7f   :  { %v682_v21 = vpack.c.bf16 %v373_v20, %v372_v19 }
  0x80   :  { %681 = vmatpush3.bf16.msra.mxu0 %v680_v18 }
  0x81   :  { %657 = vmatpush1.bf16.msra.mxu1 %v656_v23  ;;  %v357_v23 = vld [vmem:[#allocation8 + $0x38] sm:$0xff]  ;;  %683 = vmatprep.subr.bf16.mxu0 %v682_v21 }
  0x82   :  { %659 = vmatprep.subr.bf16.mxu1 %v658_v26  ;;  %v684_v24 = vpack.c.bf16 %v357_v23, %v356_v22  ;;  %v375_v26 = vld [vmem:[#allocation8 + $0xc8] sm:$0xff] }
  0x83   :  { %v686_v27 = vpack.c.bf16 %v375_v26, %v374_v25 }
  0x84   :  { %685 = vmatpush3.bf16.msra.mxu0 %v684_v24 }
  0x85   :  { %661 = vmatpush1.bf16.msra.mxu1 %v660_v29  ;;  %v359_v29 = vld [vmem:[#allocation8 + $0x48] sm:$0xff]  ;;  %687 = vmatprep.subr.bf16.mxu0 %v686_v27 }
  0x86   :  { %663 = vmatprep.subr.bf16.mxu1 %v662_v32  ;;  %v688_v30 = vpack.c.bf16 %v359_v29, %v358_v28  ;;  %v377_v32 = vld [vmem:[#allocation8 + $0xd8] sm:$0xff] }
  0x87   :  { %v690_v33 = vpack.c.bf16 %v377_v32, %v376_v31 }
  0x88   :  { %689 = vmatpush3.bf16.msra.mxu0 %v688_v30 }
  0x89   :  { %665 = vmatpush1.bf16.msra.mxu1 %v664_v35  ;;  %v361_v35 = vld [vmem:[#allocation8 + $0x58] sm:$0xff]  ;;  %691 = vmatprep.subr.bf16.mxu0 %v690_v33 }
  0x8a   :  { %667 = vmatprep.subr.bf16.mxu1 %v666_v38  ;;  %v692_v36 = vpack.c.bf16 %v361_v35, %v360_v34  ;;  %v379_v38 = vld [vmem:[#allocation8 + $0xe8] sm:$0xff] }
  0x8b   :  { %v694_v39 = vpack.c.bf16 %v379_v38, %v378_v37 }
  0x8c   :  { %693 = vmatpush3.bf16.msra.mxu0 %v692_v36 }
  0x8d   :  { %669 = vmatpush1.bf16.msra.mxu1 %v668_v41  ;;  %v363_v41 = vld [vmem:[#allocation8 + $0x68] sm:$0xff]  ;;  %695 = vmatprep.subr.bf16.mxu0 %v694_v39 }
  0x8e   :  { %v696_v42 = vpack.c.bf16 %v363_v41, %v362_v40 }
  0x90   :  { %697 = vmatpush3.bf16.msra.mxu0 %v696_v42 }
 0x124   :  { %v170_v49 = vpop.f32.mrb[0].mxu0 }
 0x125   :  { %v171_v50 = vadd.f32 %v170_v49, %v93_v47  ;;  %v172_v51 = vpop.f32.mrb[1].mxu0  ;;  %v381_v47 = vld [vmem:[#allocation8 + $0xf8] sm:$0xff]  ;;  %v364_v49 = vld [vmem:[#allocation8 + $0x70] sm:$0xff] }
 0x126   :  { %v173_v52 = vadd.f32 %v172_v51, %v97_v48  ;;  %v698_v48 = vpack.c.bf16 %v381_v47, %v380_v45 }
 0x127   :  { %v551_v53 = vmul.f32 -1.442695, %v171_v50 }
 0x128   :  { %v552_v54 = vmul.f32 -1.442695, %v173_v52  ;;  %699 = vmatprep.subr.bf16.mxu0 %v698_v48 }
 0x129   :  { %717 = vpow2.f32 %v551_v53  ;;  %v253_v53 = vld [vmem:[%s1013_s4] sm:$0x3] }
 0x12a   :  { %719 = vpow2.f32 %v552_v54  ;;  %v258_v54 = vrot.slane %v253_v53, %v92_v44  ;;  %v459_v44 = vld [vmem:[%s1016_s7] sm:$0xff]  ;;  %s862_s7 = smov [#allocation10]  }
 0x12b   :  { %v703_v5 = vpack.c.bf16 %v460_v43, %v459_v44  ;;  %s539_s18 = sshll.u32 %s862_s7, 4  ;;  %s540_s18 = int_to_ptr.vmem [resolvable:$true] %s539_s18 }
 0x12c   :  { %s821_s19 = scalar_lea.vmem %s540_s18, 128  ;;  %p826_p5 = scmp.lt.s32.totalorder %s540_s18, %s540_s18 }
 0x12d   :  { %p822_p4 = scmp.ne.s32.totalorder %s540_s18, %s821_s19  ;;  %p827_p6 = scmp.lt.s32.totalorder %s821_s19, %s821_s19 }
 0x12f   :  { %p828_p7 = por %p827_p6, %p826_p5 }
 0x131   :  { %p829_p8 = pnand %p828_p7, %p822_p4 }
 0x133   :  { %v718_v55 = vpop.eup %717 }
 0x134   :  { %v720_v56 = vpop.eup %719  ;;  %v181_v57 = vadd.f32 1.0, %v718_v55  ;;  %v262_v55 = vrot.slane %v253_v53, %v96_v46 }
 0x135   :  { %v182_v58 = vadd.f32 1.0, %v720_v56 }
 0x136   :  { %721 = vrcp.f32 %v181_v57 }
 0x137   :  { %723 = vrcp.f32 %v182_v58 }
 0x140   :  { %v722_v59 = vpop.eup %721 }
 0x141   :  { %v724_v60 = vpop.eup %723  ;;  %v187_v62 = vmul.f32 %v722_v59, %v171_v50  ;;  %v365_v50 = vld [vmem:[#allocation8 + $0x78] sm:$0xff] }
 0x142   :  { %v188_v61 = vmul.f32 %v724_v60, %v173_v52  ;;  %v700_v51 = vpack.c.bf16 %v365_v50, %v364_v49  ;;  %v860_v52 = vmov 0.0|0.0  }
 0x144   :  { %329 = vmatprep.mubr.f32.mxu1 %v188_v61  ;;  %701 = vmatpush3.bf16.msra.mxu0 %v700_v51 }
 0x145   :  { %330 = vmatmul.mubr.f32.vlgmr.msra.gmra.mrb[0].mxu1 %v187_v62  ;;  %702 = vmatprep.subr.bf16.mxu0 %v860_v52 }
 0x218   :  { %v331_v56 = vpop.f32.mrb[0].mxu1 }
 0x219   :  { %v332_v57 = vadd.f32 %v331_v56, %v258_v54  ;;  %v333_v58 = vpop.f32.mrb[1].mxu1 }
 0x21a   :  { %v334_v59 = vadd.f32 %v333_v58, %v262_v55 }
 0x21b   :  { %v553_v60 = vmul.f32 -1.442695, %v332_v57 }
 0x21c   :  { %v554_v61 = vmul.f32 -1.442695, %v334_v59 }
 0x21d   :  { %725 = vpow2.f32 %v553_v60 }
 0x21e   :  { %727 = vpow2.f32 %v554_v61 }
 0x227   :  { %v726_v62 = vpop.eup %725 }
 0x228   :  { %v728_v63 = vpop.eup %727  ;;  %v342_v1 = vadd.f32 1.0, %v726_v62 }
 0x229   :  { %v343_v2 = vadd.f32 1.0, %v728_v63 }
 0x22a   :  { %729 = vrcp.f32 %v342_v1 }
 0x22b   :  { %731 = vrcp.f32 %v343_v2 }
 0x234   :  { %v730_v46 = vpop.eup %729 }
 0x235   :  { %v732_v3 = vpop.eup %731  ;;  %v348_v6 = vmul.f32 %v730_v46, %v332_v57 }
 0x236   :  { %v349_v4 = vmul.f32 %v732_v3, %v334_v59 }
 0x238   :  { %453 = vmatprep.mubr.f32.mxu0 %v349_v4 }
 0x239   :  { %454 = vmatmul.mubr.f32.vlgmr.msra.gmra.mrb[2].mxu0 %v348_v6 }
 0x23a   :  { %704 = vmatpush3.bf16.msra.mxu0 %v703_v5  ;;  %599 = vmatprep.mubr.msk.f32.mxu0 %vm861_vm1, %v859_v0 }
 0x23d   :  { %600 = vmatmul.mubr.msk.f32.vlgmr.msra.gmra.mrb[4].mxu0 %vm100_vm0, %v963_v8 }
 0x30c   :  { %v589_v7 = vpop.f32.mrb[2].mxu0 }
 0x30d   :  { %v590_v9 = vpop.f32.mrb[3].mxu0 }
 0x30e   :  { %v591_v11 = vadd.f32 %v590_v9, %v589_v7 }
 0x310   :  { %v456_v12 = vadd.f32 %v591_v11, %v555_v10  ;;  %v527_v13 = vpop.f32.mrb[4].mxu0 }
 0x311   :  { %v601_v14 = vpop.f32.mrb[5].mxu0 }
 0x312   :  { %v531_v15 = vadd.f32 %v527_v13, %v456_v12 }
 0x314   :  { %532 = vst [vmem:[#allocation10] sm:$0xff] %v531_v15 }
 0x315   :  { %832 = shalt.err (!%p829_p8)
}
 0x316   :  { %s833_s6 = scalar_lea.hbm %s1017_s8, 128 }
 0x317   :  { %p834_p9 = scmp.ne.s32.totalorder %s1017_s8, %s833_s6  ;;  %p837_p10 = scmp.lt.u32.totalorder %s833_s6, %s1017_s8 }
 0x319   :  { %p839_p11 = pnand %p837_p10, %p834_p9 }
 0x31b   :  { %842 = shalt.err (!%p839_p11)
}
 0x31c   :  { %542 = dma.vmem_to_hbm [thread:$0]  %s540_s18, 128, %s1017_s8, [#allocation4]  }
 0x31d   :  { %849 = dma.done.wait [#allocation4], 128  }
 0x31e   :  { %850 = vsyncadd [#allocation4], 4294967168 }
 0x31f   :  { %546 = vsyncpa [#allocation3], 1 }
 0x320   :  { %547 = vsyncpa [#allocation6], 1 }
 0x321   :  { %548 = vsyncpa [#allocation9], 1 }
 0x322   :  { %549 = vsyncpa [#allocation4], 1 }

// kernel: tpu_custom_call.1
= control target key start
LH: loop header
LB: loop body
LE: loop exit
PB: predicated region body
PF: predicated region fallthrough
CT: control target
= control target key end

     0   :  { %13 = vsyncpa [#allocation3], 0  ;;  %s1009_s0 = inlined_call_operand.hbm [shape: f32[8,16], index: 0, kind: input, shape index: {}]   ;;  %s1010_s1 = inlined_call_operand.hbm [shape: f32[16,256], index: 1, kind: input, shape index: {}]   ;;  %s1011_s2 = inlined_call_operand.vmem [shape: f32[1,256], index: 2, kind: input, shape index: {}]   ;;  %s1012_s3 = inlined_call_operand.hbm [shape: f32[256,256], index: 3, kind: input, shape index: {}]   ;;  %s1013_s4 = inlined_call_operand.vmem [shape: f32[1,256], index: 4, kind: input, shape index: {}]   ;;  %s1014_s5 = inlined_call_operand.hbm [shape: f32[256,128], index: 5, kind: input, shape index: {}]   ;;  %s1015_s6 = inlined_call_operand.vmem [shape: f32[1,128], index: 6, kind: input, shape index: {}]   ;;  %s1016_s7 = inlined_call_operand.vmem [shape: f32[16,128], index: 7, kind: input, shape index: {}]   ;;  %s1017_s8 = inlined_call_operand.hbm [shape: f32[8,128], index: 8, kind: output, shape index: {}]  }
   0x1   :  { %14 = vsyncpa [#allocation6], 0 }
   0x2   :  { %15 = vsyncpa [#allocation9], 0 }
   0x3   :  { %16 = vsyncpa [#allocation4], 0  ;;  %s851_s27 = smov [#allocation5]   ;;  %s733_s9 = scalar_lea.hbm %s1010_s1, 512 }
   0x4   :  { %s32_s28 = sshll.u32 %s851_s27, 4  ;;  %p734_p0 = scmp.ne.s32.totalorder %s1010_s1, %s733_s9  ;;  %s33_s28 = int_to_ptr.vmem [resolvable:$true] %s32_s28 }
   0x5   :  { %p737_p1 = scmp.lt.u32.totalorder %s733_s9, %s1010_s1 }
   0x7   :  { %p739_p2 = pnand %p737_p1, %p734_p0 }
   0x9   :  { %742 = shalt.err (!%p739_p2)
}
   0xa   :  { %s743_s14 = scalar_lea.vmem %s33_s28, 512  ;;  %p748_p4 = scmp.lt.s32.totalorder %s33_s28, %s33_s28 }
   0xb   :  { %p744_p3 = scmp.ne.s32.totalorder %s33_s28, %s743_s14  ;;  %p749_p5 = scmp.lt.s32.totalorder %s743_s14, %s743_s14 }
   0xd   :  { %p750_p6 = por %p749_p5, %p748_p4 }
   0xf   :  { %p751_p7 = pnand %p750_p6, %p744_p3 }
  0x11   :  { %754 = shalt.err (!%p751_p7)
}
  0x12   :  { %s852_s15 = smov 256   ;;  %s853_s16 = smov 16  }
  0x13   :  { %38 = dma.hbm_to_vmem [thread:$0]  %s1010_s1, 512, %s33_s28, [#allocation6], %s852_s15, %s852_s15, %s853_s16  }
  0x14   :  { %s854_s19 = smov [#allocation2]   ;;  %s855_s21 = smov [#allocation7]  }
  0x15   :  { %s23_s20 = sshll.u32 %s854_s19, 4  ;;  %s46_s22 = sshll.u32 %s855_s21, 4  ;;  %s24_s20 = int_to_ptr.vmem [resolvable:$true] %s23_s20  ;;  %s47_s22 = int_to_ptr.vmem [resolvable:$true] %s46_s22 }
  0x16   :  { %s755_s25 = scalar_lea.hbm %s1009_s0, 128 }
  0x17   :  { %p756_p8 = scmp.ne.s32.totalorder %s1009_s0, %s755_s25  ;;  %p759_p9 = scmp.lt.u32.totalorder %s755_s25, %s1009_s0 }
  0x19   :  { %p761_p10 = pnand %p759_p9, %p756_p8 }
  0x1b   :  { %764 = shalt.err (!%p761_p10)
}
  0x1c   :  { %s765_s1 = scalar_lea.vmem %s24_s20, 128  ;;  %p770_p12 = scmp.lt.s32.totalorder %s24_s20, %s24_s20 }
  0x1d   :  { %p766_p11 = scmp.ne.s32.totalorder %s24_s20, %s765_s1  ;;  %p771_p13 = scmp.lt.s32.totalorder %s765_s1, %s765_s1 }
  0x1f   :  { %p772_p0 = por %p771_p13, %p770_p12 }
  0x21   :  { %p773_p1 = pnand %p772_p0, %p766_p11 }
  0x23   :  { %776 = shalt.err (!%p773_p1)
}
  0x24   :  { %26 = dma.hbm_to_vmem [thread:$0]  %s1009_s0, 128, %s24_s20, [#allocation3]  }
  0x25   :  { %s777_s12 = scalar_lea.hbm %s1012_s3, 8192 }
  0x26   :  { %p778_p2 = scmp.ne.s32.totalorder %s1012_s3, %s777_s12  ;;  %p781_p3 = scmp.lt.u32.totalorder %s777_s12, %s1012_s3 }
  0x28   :  { %p783_p4 = pnand %p781_p3, %p778_p2 }
  0x2a   :  { %786 = shalt.err (!%p783_p4)
}
  0x2b   :  { %s787_s19 = scalar_lea.vmem %s47_s22, 8192  ;;  %p792_p6 = scmp.lt.s32.totalorder %s47_s22, %s47_s22 }
  0x2c   :  { %p788_p5 = scmp.ne.s32.totalorder %s47_s22, %s787_s19  ;;  %p793_p7 = scmp.lt.s32.totalorder %s787_s19, %s787_s19 }
  0x2e   :  { %p794_p8 = por %p793_p7, %p792_p6 }
  0x30   :  { %p795_p9 = pnand %p794_p8, %p788_p5 }
  0x32   :  { %798 = shalt.err (!%p795_p9)
}
  0x33   :  { %52 = dma.hbm_to_vmem [thread:$0]  %s1012_s3, 8192, %s47_s22, [#allocation6], %s852_s15, %s852_s15, %s853_s16  }
  0x34   :  { %s856_s21 = smov [#allocation8]   ;;  %s799_s26 = scalar_lea.hbm %s1014_s5, 4096 }
  0x35   :  { %s60_s23 = sshll.u32 %s856_s21, 4  ;;  %p800_p10 = scmp.ne.s32.totalorder %s1014_s5, %s799_s26  ;;  %s61_s23 = int_to_ptr.vmem [resolvable:$true] %s60_s23 }
  0x36   :  { %p803_p11 = scmp.lt.u32.totalorder %s799_s26, %s1014_s5 }
  0x38   :  { %p805_p12 = pnand %p803_p11, %p800_p10 }
  0x3a   :  { %808 = shalt.err (!%p805_p12)
}
  0x3b   :  { %s809_s28 = scalar_lea.vmem %s61_s23, 4096  ;;  %p814_p0 = scmp.lt.s32.totalorder %s61_s23, %s61_s23 }
  0x3c   :  { %p810_p13 = scmp.ne.s32.totalorder %s61_s23, %s809_s28  ;;  %p815_p1 = scmp.lt.s32.totalorder %s809_s28, %s809_s28 }
  0x3e   :  { %p816_p2 = por %p815_p1, %p814_p0 }
  0x40   :  { %p817_p3 = pnand %p816_p2, %p810_p13 }
  0x42   :  { %820 = shalt.err (!%p817_p3)
}
  0x43   :  { %s857_s3 = smov 128   ;;  %s858_s15 = smov 8  }
  0x44   :  { %66 = dma.hbm_to_vmem [thread:$0]  %s1014_s5, 4096, %s61_s23, [#allocation9], %s857_s3, %s857_s3, %s858_s15  }
  0x45   :  { %843 = dma.done.wait [#allocation3], 128  }
  0x46   :  { %844 = vsyncadd [#allocation3], 4294967168 }
  0x47   :  { %845 = dma.done.wait [#allocation6], 8704  }
  0x48   :  { %846 = vsyncadd [#allocation6], 4294958592 }
  0x49   :  { %847 = dma.done.wait [#allocation9], 4096  }
  0x4a   :  { %848 = vsyncadd [#allocation9], 4294963200  ;;  %v859_v0 = vmov 0.0   ;;  %v85_v1 = vld [vmem:[#allocation5 + $0x8] sm:$0xff]  ;;  %v87_v2 = vld [vmem:[#allocation5 + $0x18] sm:$0xff]  ;;  %vm100_vm0 = vcmask 130048  }
  0x4b   :  { %168 = vmatprep.mubr.f32.mxu0 %v859_v0  ;;  %v84_v3 = vld [vmem:[#allocation5] sm:$0xff]  ;;  %v602_v4 = vpack.c.bf16 %v87_v2, %v85_v1  ;;  %v86_v5 = vld [vmem:[#allocation5 + $0x10] sm:$0xff]  ;;  %v190_v6 = vld [vmem:[#allocation7 + $0x8] sm:$0xff]  ;;  %vm861_vm1 = vmmov 0  }
  0x4c   :  { %v604_v7 = vpack.c.bf16 %v86_v5, %v84_v3  ;;  %v963_v8 = vld [vmem:[#allocation2] sm:$0xff]  ;;  %v189_v10 = vld [vmem:[#allocation7] sm:$0xff]  ;;  %v191_v11 = vld [vmem:[#allocation7 + $0x10] sm:$0xff] }
  0x4d   :  { %v192_v9 = vld [vmem:[#allocation7 + $0x18] sm:$0xff]  ;;  %603 = vmatprep.subr.bf16.mxu0 %v602_v4  ;;  %v608_v13 = vpack.c.bf16 %v191_v11, %v189_v10  ;;  %v194_v14 = vld [vmem:[#allocation7 + $0x28] sm:$0xff]  ;;  %v193_v16 = vld [vmem:[#allocation7 + $0x20] sm:$0xff] }
  0x4e   :  { %v606_v12 = vpack.c.bf16 %v192_v9, %v190_v6  ;;  %v196_v15 = vld [vmem:[#allocation7 + $0x38] sm:$0xff]  ;;  %605 = vmatpush1.bf16.msra.mxu0 %v604_v7  ;;  %v195_v18 = vld [vmem:[#allocation7 + $0x30] sm:$0xff]  ;;  %v198_v19 = vld [vmem:[#allocation7 + $0x48] sm:$0xff] }
  0x4f   :  { %v610_v17 = vpack.c.bf16 %v196_v15, %v194_v14  ;;  %v200_v20 = vld [vmem:[#allocation7 + $0x58] sm:$0xff]  ;;  %v612_v21 = vpack.c.bf16 %v195_v18, %v193_v16  ;;  %v197_v23 = vld [vmem:[#allocation7 + $0x40] sm:$0xff]  ;;  %v199_v24 = vld [vmem:[#allocation7 + $0x50] sm:$0xff] }
  0x50   :  { %607 = vmatprep.subr.bf16.mxu1 %v606_v12  ;;  %v614_v22 = vpack.c.bf16 %v200_v20, %v198_v19  ;;  %v202_v25 = vld [vmem:[#allocation7 + $0x68] sm:$0xff]  ;;  %v204_v26 = vld [vmem:[#allocation7 + $0x78] sm:$0xff]  ;;  %v616_v27 = vpack.c.bf16 %v199_v24, %v197_v23  ;;  %v201_v29 = vld [vmem:[#allocation7 + $0x60] sm:$0xff] }
  0x51   :  { %609 = vmatpush1.bf16.msra.mxu1 %v608_v13  ;;  %550 = vmatmul.mubr.msk.f32.vlgmr.msra.gmra.mrb[0].mxu0 %vm100_vm0, %v963_v8  ;;  %v618_v28 = vpack.c.bf16 %v204_v26, %v202_v25  ;;  %v203_v30 = vld [vmem:[#allocation7 + $0x70] sm:$0xff]  ;;  %v206_v31 = vld [vmem:[#allocation7 + $0x88] sm:$0xff]  ;;  %v208_v32 = vld [vmem:[#allocation7 + $0x98] sm:$0xff] }
  0x52   :  { %611 = vmatprep.subr.bf16.mxu1 %v610_v17  ;;  %v620_v33 = vpack.c.bf16 %v203_v30, %v201_v29  ;;  %v622_v34 = vpack.c.bf16 %v208_v32, %v206_v31  ;;  %v205_v35 = vld [vmem:[#allocation7 + $0x80] sm:$0xff]  ;;  %v207_v36 = vld [vmem:[#allocation7 + $0x90] sm:$0xff]  ;;  %v210_v37 = vld [vmem:[#allocation7 + $0xa8] sm:$0xff] }
  0x53   :  { %v212_v38 = vld [vmem:[#allocation7 + $0xb8] sm:$0xff]  ;;  %v624_v39 = vpack.c.bf16 %v207_v36, %v205_v35  ;;  %v209_v41 = vld [vmem:[#allocation7 + $0xa0] sm:$0xff]  ;;  %v211_v42 = vld [vmem:[#allocation7 + $0xb0] sm:$0xff] }
  0x54   :  { %v626_v40 = vpack.c.bf16 %v212_v38, %v210_v37  ;;  %v214_v43 = vld [vmem:[#allocation7 + $0xc8] sm:$0xff]  ;;  %v216_v44 = vld [vmem:[#allocation7 + $0xd8] sm:$0xff]  ;;  %v628_v45 = vpack.c.bf16 %v211_v42, %v209_v41  ;;  %v213_v47 = vld [vmem:[#allocation7 + $0xc0] sm:$0xff]  ;;  %v90_v42 = vlaneseq }
  0x55   :  { %613 = vmatpush1.bf16.msra.mxu1 %v612_v21  ;;  %v630_v46 = vpack.c.bf16 %v216_v44, %v214_v43  ;;  %v215_v48 = vld [vmem:[#allocation7 + $0xd0] sm:$0xff]  ;;  %v218_v49 = vld [vmem:[#allocation7 + $0xe8] sm:$0xff]  ;;  %v220_v50 = vld [vmem:[#allocation7 + $0xf8] sm:$0xff] }
  0x56   :  { %615 = vmatprep.subr.bf16.mxu1 %v614_v22  ;;  %v632_v51 = vpack.c.bf16 %v215_v48, %v213_v47  ;;  %v634_v52 = vpack.c.bf16 %v220_v50, %v218_v49  ;;  %v217_v53 = vld [vmem:[#allocation7 + $0xe0] sm:$0xff]  ;;  %v219_v54 = vld [vmem:[#allocation7 + $0xf0] sm:$0xff]  ;;  %v222_v56 = vld [vmem:[#allocation7 + $0x108] sm:$0xff]  ;;  %v967_v43 = vshrl.u32 %v90_v42, 7 }
  0x57   :  { %v636_v55 = vpack.c.bf16 %v219_v54, %v217_v53  ;;  %v224_v57 = vld [vmem:[#allocation7 + $0x118] sm:$0xff]  ;;  %v221_v59 = vld [vmem:[#allocation7 + $0x100] sm:$0xff]  ;;  %v223_v60 = vld [vmem:[#allocation7 + $0x110] sm:$0xff] }
  0x58   :  { %v638_v58 = vpack.c.bf16 %v224_v57, %v222_v56  ;;  %v640_v61 = vpack.c.bf16 %v223_v60, %v221_v59  ;;  %v226_v62 = vld [vmem:[#allocation7 + $0x128] sm:$0xff]  ;;  %v228_v63 = vld [vmem:[#allocation7 + $0x138] sm:$0xff]  ;;  %v225_v2 = vld [vmem:[#allocation7 + $0x120] sm:$0xff]  ;;  %v92_v44 = vsub.s32 0, %v967_v43 }
  0x59   :  { %617 = vmatpush1.bf16.msra.mxu1 %v616_v27  ;;  %v642_v1 = vpack.c.bf16 %v228_v63, %v226_v62  ;;  %v227_v3 = vld [vmem:[#allocation7 + $0x130] sm:$0xff]  ;;  %v230_v5 = vld [vmem:[#allocation7 + $0x148] sm:$0xff]  ;;  %v232_v6 = vld [vmem:[#allocation7 + $0x158] sm:$0xff] }
  0x5a   :  { %619 = vmatprep.subr.bf16.mxu1 %v618_v28  ;;  %v644_v4 = vpack.c.bf16 %v227_v3, %v225_v2  ;;  %v646_v7 = vpack.c.bf16 %v232_v6, %v230_v5  ;;  %v229_v9 = vld [vmem:[#allocation7 + $0x140] sm:$0xff]  ;;  %v231_v10 = vld [vmem:[#allocation7 + $0x150] sm:$0xff]  ;;  %v234_v12 = vld [vmem:[#allocation7 + $0x168] sm:$0xff] }
  0x5b   :  { %v648_v11 = vpack.c.bf16 %v231_v10, %v229_v9  ;;  %v236_v13 = vld [vmem:[#allocation7 + $0x178] sm:$0xff]  ;;  %v233_v15 = vld [vmem:[#allocation7 + $0x160] sm:$0xff]  ;;  %v235_v16 = vld [vmem:[#allocation7 + $0x170] sm:$0xff] }
  0x5c   :  { %v650_v14 = vpack.c.bf16 %v236_v13, %v234_v12  ;;  %v652_v17 = vpack.c.bf16 %v235_v16, %v233_v15  ;;  %v238_v18 = vld [vmem:[#allocation7 + $0x188] sm:$0xff]  ;;  %v240_v19 = vld [vmem:[#allocation7 + $0x198] sm:$0xff]  ;;  %v237_v21 = vld [vmem:[#allocation7 + $0x180] sm:$0xff] }
  0x5d   :  { %621 = vmatpush1.bf16.msra.mxu1 %v620_v33  ;;  %v654_v20 = vpack.c.bf16 %v240_v19, %v238_v18  ;;  %v239_v22 = vld [vmem:[#allocation7 + $0x190] sm:$0xff]  ;;  %v242_v24 = vld [vmem:[#allocation7 + $0x1a8] sm:$0xff]  ;;  %v244_v25 = vld [vmem:[#allocation7 + $0x1b8] sm:$0xff] }
  0x5e   :  { %623 = vmatprep.subr.bf16.mxu1 %v622_v34  ;;  %v656_v23 = vpack.c.bf16 %v239_v22, %v237_v21  ;;  %v658_v26 = vpack.c.bf16 %v244_v25, %v242_v24  ;;  %v241_v27 = vld [vmem:[#allocation7 + $0x1a0] sm:$0xff]  ;;  %v243_v28 = vld [vmem:[#allocation7 + $0x1b0] sm:$0xff]  ;;  %v246_v30 = vld [vmem:[#allocation7 + $0x1c8] sm:$0xff] }
  0x5f   :  { %v660_v29 = vpack.c.bf16 %v243_v28, %v241_v27  ;;  %v248_v31 = vld [vmem:[#allocation7 + $0x1d8] sm:$0xff]  ;;  %v245_v33 = vld [vmem:[#allocation7 + $0x1c0] sm:$0xff]  ;;  %v247_v34 = vld [vmem:[#allocation7 + $0x1d0] sm:$0xff] }
  0x60   :  { %v662_v32 = vpack.c.bf16 %v248_v31, %v246_v30  ;;  %v664_v35 = vpack.c.bf16 %v247_v34, %v245_v33  ;;  %v250_v36 = vld [vmem:[#allocation7 + $0x1e8] sm:$0xff]  ;;  %v252_v37 = vld [vmem:[#allocation7 + $0x1f8] sm:$0xff]  ;;  %v366_v63 = vld [vmem:[#allocation8 + $0x80] sm:$0xff] }
  0x61   :  { %625 = vmatpush1.bf16.msra.mxu1 %v624_v39  ;;  %v666_v38 = vpack.c.bf16 %v252_v37, %v250_v36  ;;  %v249_v39 = vld [vmem:[#allocation7 + $0x1e0] sm:$0xff]  ;;  %v368_v6 = vld [vmem:[#allocation8 + $0x90] sm:$0xff] }
  0x62   :  { %627 = vmatprep.subr.bf16.mxu1 %v626_v40  ;;  %v251_v40 = vld [vmem:[#allocation7 + $0x1f0] sm:$0xff]  ;;  %v350_v3 = vld [vmem:[#allocation8] sm:$0xff] }
  0x63   :  { %v668_v41 = vpack.c.bf16 %v251_v40, %v249_v39  ;;  %v352_v10 = vld [vmem:[#allocation8 + $0x10] sm:$0xff]  ;;  %v370_v13 = vld [vmem:[#allocation8 + $0xa0] sm:$0xff] }
  0x64   :  { %v354_v16 = vld [vmem:[#allocation8 + $0x20] sm:$0xff]  ;;  %v372_v19 = vld [vmem:[#allocation8 + $0xb0] sm:$0xff] }
  0x65   :  { %629 = vmatpush1.bf16.msra.mxu1 %v628_v45  ;;  %v88_v45 = vld [vmem:[%s1011_s2] sm:$0x3]  ;;  %v356_v22 = vld [vmem:[#allocation8 + $0x30] sm:$0xff]  ;;  %v374_v25 = vld [vmem:[#allocation8 + $0xc0] sm:$0xff] }
  0x66   :  { %631 = vmatprep.subr.bf16.mxu1 %v630_v46  ;;  %v96_v46 = vsub.s32 1, %v967_v43  ;;  %v93_v47 = vrot.slane %v88_v45, %v92_v44  ;;  %v358_v28 = vld [vmem:[#allocation8 + $0x40] sm:$0xff]  ;;  %v376_v31 = vld [vmem:[#allocation8 + $0xd0] sm:$0xff] }
  0x67   :  { %v360_v34 = vld [vmem:[#allocation8 + $0x50] sm:$0xff]  ;;  %v378_v37 = vld [vmem:[#allocation8 + $0xe0] sm:$0xff] }
  0x68   :  { %v97_v48 = vrot.slane %v88_v45, %v96_v46  ;;  %v362_v40 = vld [vmem:[#allocation8 + $0x60] sm:$0xff]  ;;  %v380_v45 = vld [vmem:[#allocation8 + $0xf0] sm:$0xff] }
  0x69   :  { %633 = vmatpush1.bf16.msra.mxu1 %v632_v51  ;;  %v460_v43 = vld [vmem:[%s1016_s7 + $0x8] sm:$0xff] }
  0x6a   :  { %635 = vmatprep.subr.bf16.mxu1 %v634_v52 }
  0x6d   :  { %637 = vmatpush1.bf16.msra.mxu1 %v636_v55 }
  0x6e   :  { %639 = vmatprep.subr.bf16.mxu1 %v638_v58 }
  0x71   :  { %641 = vmatpush1.bf16.msra.mxu1 %v640_v61 }
  0x72   :  { %643 = vmatprep.subr.bf16.mxu1 %v642_v1  ;;  %v367_v1 = vld [vmem:[#allocation8 + $0x88] sm:$0xff] }
  0x73   :  { %v670_v2 = vpack.c.bf16 %v367_v1, %v366_v63 }
  0x75   :  { %645 = vmatpush1.bf16.msra.mxu1 %v644_v4  ;;  %v351_v4 = vld [vmem:[#allocation8 + $0x8] sm:$0xff]  ;;  %671 = vmatprep.subr.bf16.mxu0 %v670_v2 }
  0x76   :  { %647 = vmatprep.subr.bf16.mxu1 %v646_v7  ;;  %v672_v5 = vpack.c.bf16 %v351_v4, %v350_v3  ;;  %v369_v7 = vld [vmem:[#allocation8 + $0x98] sm:$0xff] }
  0x77   :  { %v674_v9 = vpack.c.bf16 %v369_v7, %v368_v6 }
  0x78   :  { %673 = vmatpush3.bf16.msra.mxu0 %v672_v5 }
  0x79   :  { %649 = vmatpush1.bf16.msra.mxu1 %v648_v11  ;;  %v353_v11 = vld [vmem:[#allocation8 + $0x18] sm:$0xff]  ;;  %675 = vmatprep.subr.bf16.mxu0 %v674_v9 }
  0x7a   :  { %651 = vmatprep.subr.bf16.mxu1 %v650_v14  ;;  %v676_v12 = vpack.c.bf16 %v353_v11, %v352_v10  ;;  %v371_v14 = vld [vmem:[#allocation8 + $0xa8] sm:$0xff] }
  0x7b   :  { %v678_v15 = vpack.c.bf16 %v371_v14, %v370_v13  ;;  %v555_v10 = vld [vmem:[%s1015_s6] ss:$0 sm:$0xff] }
  0x7c   :  { %677 = vmatpush3.bf16.msra.mxu0 %v676_v12 }
  0x7d   :  { %653 = vmatpush1.bf16.msra.mxu1 %v652_v17  ;;  %v355_v17 = vld [vmem:[#allocation8 + $0x28] sm:$0xff]  ;;  %679 = vmatprep.subr.bf16.mxu0 %v678_v15 }
  0x7e   :  { %655 = vmatprep.subr.bf16.mxu1 %v654_v20  ;;  %v680_v18 = vpack.c.bf16 %v355_v17, %v354_v16  ;;  %v373_v20 = vld [vmem:[#allocation8 + $0xb8] sm:$0xff] }
  0x7f   :  { %v682_v21 = vpack.c.bf16 %v373_v20, %v372_v19 }
  0x80   :  { %681 = vmatpush3.bf16.msra.mxu0 %v680_v18 }
  0x81   :  { %657 = vmatpush1.bf16.msra.mxu1 %v656_v23  ;;  %v357_v23 = vld [vmem:[#allocation8 + $0x38] sm:$0xff]  ;;  %683 = vmatprep.subr.bf16.mxu0 %v682_v21 }
  0x82   :  { %659 = vmatprep.subr.bf16.mxu1 %v658_v26  ;;  %v684_v24 = vpack.c.bf16 %v357_v23, %v356_v22  ;;  %v375_v26 = vld [vmem:[#allocation8 + $0xc8] sm:$0xff] }
  0x83   :  { %v686_v27 = vpack.c.bf16 %v375_v26, %v374_v25 }
  0x84   :  { %685 = vmatpush3.bf16.msra.mxu0 %v684_v24 }
  0x85   :  { %661 = vmatpush1.bf16.msra.mxu1 %v660_v29  ;;  %v359_v29 = vld [vmem:[#allocation8 + $0x48] sm:$0xff]  ;;  %687 = vmatprep.subr.bf16.mxu0 %v686_v27 }
  0x86   :  { %663 = vmatprep.subr.bf16.mxu1 %v662_v32  ;;  %v688_v30 = vpack.c.bf16 %v359_v29, %v358_v28  ;;  %v377_v32 = vld [vmem:[#allocation8 + $0xd8] sm:$0xff] }
  0x87   :  { %v690_v33 = vpack.c.bf16 %v377_v32, %v376_v31 }
  0x88   :  { %689 = vmatpush3.bf16.msra.mxu0 %v688_v30 }
  0x89   :  { %665 = vmatpush1.bf16.msra.mxu1 %v664_v35  ;;  %v361_v35 = vld [vmem:[#allocation8 + $0x58] sm:$0xff]  ;;  %691 = vmatprep.subr.bf16.mxu0 %v690_v33 }
  0x8a   :  { %667 = vmatprep.subr.bf16.mxu1 %v666_v38  ;;  %v692_v36 = vpack.c.bf16 %v361_v35, %v360_v34  ;;  %v379_v38 = vld [vmem:[#allocation8 + $0xe8] sm:$0xff] }
  0x8b   :  { %v694_v39 = vpack.c.bf16 %v379_v38, %v378_v37 }
  0x8c   :  { %693 = vmatpush3.bf16.msra.mxu0 %v692_v36 }
  0x8d   :  { %669 = vmatpush1.bf16.msra.mxu1 %v668_v41  ;;  %v363_v41 = vld [vmem:[#allocation8 + $0x68] sm:$0xff]  ;;  %695 = vmatprep.subr.bf16.mxu0 %v694_v39 }
  0x8e   :  { %v696_v42 = vpack.c.bf16 %v363_v41, %v362_v40 }
  0x90   :  { %697 = vmatpush3.bf16.msra.mxu0 %v696_v42 }
 0x124   :  { %v170_v49 = vpop.f32.mrb[0].mxu0 }
 0x125   :  { %v171_v50 = vadd.f32 %v170_v49, %v93_v47  ;;  %v172_v51 = vpop.f32.mrb[1].mxu0  ;;  %v381_v47 = vld [vmem:[#allocation8 + $0xf8] sm:$0xff]  ;;  %v364_v49 = vld [vmem:[#allocation8 + $0x70] sm:$0xff] }
 0x126   :  { %v173_v52 = vadd.f32 %v172_v51, %v97_v48  ;;  %v698_v48 = vpack.c.bf16 %v381_v47, %v380_v45 }
 0x127   :  { %v551_v53 = vmul.f32 -1.442695, %v171_v50 }
 0x128   :  { %v552_v54 = vmul.f32 -1.442695, %v173_v52  ;;  %699 = vmatprep.subr.bf16.mxu0 %v698_v48 }
 0x129   :  { %717 = vpow2.f32 %v551_v53  ;;  %v253_v53 = vld [vmem:[%s1013_s4] sm:$0x3] }
 0x12a   :  { %719 = vpow2.f32 %v552_v54  ;;  %v258_v54 = vrot.slane %v253_v53, %v92_v44  ;;  %v459_v44 = vld [vmem:[%s1016_s7] sm:$0xff]  ;;  %s862_s7 = smov [#allocation10]  }
 0x12b   :  { %v703_v5 = vpack.c.bf16 %v460_v43, %v459_v44  ;;  %s539_s18 = sshll.u32 %s862_s7, 4  ;;  %s540_s18 = int_to_ptr.vmem [resolvable:$true] %s539_s18 }
 0x12c   :  { %s821_s19 = scalar_lea.vmem %s540_s18, 128  ;;  %p826_p5 = scmp.lt.s32.totalorder %s540_s18, %s540_s18 }
 0x12d   :  { %p822_p4 = scmp.ne.s32.totalorder %s540_s18, %s821_s19  ;;  %p827_p6 = scmp.lt.s32.totalorder %s821_s19, %s821_s19 }
 0x12f   :  { %p828_p7 = por %p827_p6, %p826_p5 }
 0x131   :  { %p829_p8 = pnand %p828_p7, %p822_p4 }
 0x133   :  { %v718_v55 = vpop.eup %717 }
 0x134   :  { %v720_v56 = vpop.eup %719  ;;  %v181_v57 = vadd.f32 1.0, %v718_v55  ;;  %v262_v55 = vrot.slane %v253_v53, %v96_v46 }
 0x135   :  { %v182_v58 = vadd.f32 1.0, %v720_v56 }
 0x136   :  { %721 = vrcp.f32 %v181_v57 }
 0x137   :  { %723 = vrcp.f32 %v182_v58 }
 0x140   :  { %v722_v59 = vpop.eup %721 }
 0x141   :  { %v724_v60 = vpop.eup %723  ;;  %v187_v62 = vmul.f32 %v722_v59, %v171_v50  ;;  %v365_v50 = vld [vmem:[#allocation8 + $0x78] sm:$0xff] }
 0x142   :  { %v188_v61 = vmul.f32 %v724_v60, %v173_v52  ;;  %v700_v51 = vpack.c.bf16 %v365_v50, %v364_v49  ;;  %v860_v52 = vmov 0.0|0.0  }
 0x144   :  { %329 = vmatprep.mubr.f32.mxu1 %v188_v61  ;;  %701 = vmatpush3.bf16.msra.mxu0 %v700_v51 }
 0x145   :  { %330 = vmatmul.mubr.f32.vlgmr.msra.gmra.mrb[0].mxu1 %v187_v62  ;;  %702 = vmatprep.subr.bf16.mxu0 %v860_v52 }
 0x218   :  { %v331_v56 = vpop.f32.mrb[0].mxu1 }
 0x219   :  { %v332_v57 = vadd.f32 %v331_v56, %v258_v54  ;;  %v333_v58 = vpop.f32.mrb[1].mxu1 }
 0x21a   :  { %v334_v59 = vadd.f32 %v333_v58, %v262_v55 }
 0x21b   :  { %v553_v60 = vmul.f32 -1.442695, %v332_v57 }
 0x21c   :  { %v554_v61 = vmul.f32 -1.442695, %v334_v59 }
 0x21d   :  { %725 = vpow2.f32 %v553_v60 }
 0x21e   :  { %727 = vpow2.f32 %v554_v61 }
 0x227   :  { %v726_v62 = vpop.eup %725 }
 0x228   :  { %v728_v63 = vpop.eup %727  ;;  %v342_v1 = vadd.f32 1.0, %v726_v62 }
 0x229   :  { %v343_v2 = vadd.f32 1.0, %v728_v63 }
 0x22a   :  { %729 = vrcp.f32 %v342_v1 }
 0x22b   :  { %731 = vrcp.f32 %v343_v2 }
 0x234   :  { %v730_v46 = vpop.eup %729 }
 0x235   :  { %v732_v3 = vpop.eup %731  ;;  %v348_v6 = vmul.f32 %v730_v46, %v332_v57 }
 0x236   :  { %v349_v4 = vmul.f32 %v732_v3, %v334_v59 }
 0x238   :  { %453 = vmatprep.mubr.f32.mxu0 %v349_v4 }
 0x239   :  { %454 = vmatmul.mubr.f32.vlgmr.msra.gmra.mrb[2].mxu0 %v348_v6 }
 0x23a   :  { %704 = vmatpush3.bf16.msra.mxu0 %v703_v5  ;;  %599 = vmatprep.mubr.msk.f32.mxu0 %vm861_vm1, %v859_v0 }
 0x23d   :  { %600 = vmatmul.mubr.msk.f32.vlgmr.msra.gmra.mrb[4].mxu0 %vm100_vm0, %v963_v8 }
 0x30c   :  { %v589_v7 = vpop.f32.mrb[2].mxu0 }
 0x30d   :  { %v590_v9 = vpop.f32.mrb[3].mxu0 }
 0x30e   :  { %v591_v11 = vadd.f32 %v590_v9, %v589_v7 }
 0x310   :  { %v456_v12 = vadd.f32 %v591_v11, %v555_v10  ;;  %v527_v13 = vpop.f32.mrb[4].mxu0 }
 0x311   :  { %v601_v14 = vpop.f32.mrb[5].mxu0 }
 0x312   :  { %v531_v15 = vadd.f32 %v527_v13, %v456_v12 }
 0x314   :  { %532 = vst [vmem:[#allocation10] sm:$0xff] %v531_v15 }
 0x315   :  { %832 = shalt.err (!%p829_p8)
}
 0x316   :  { %s833_s6 = scalar_lea.hbm %s1017_s8, 128 }
 0x317   :  { %p834_p9 = scmp.ne.s32.totalorder %s1017_s8, %s833_s6  ;;  %p837_p10 = scmp.lt.u32.totalorder %s833_s6, %s1017_s8 }
 0x319   :  { %p839_p11 = pnand %p837_p10, %p834_p9 }
 0x31b   :  { %842 = shalt.err (!%p839_p11)
}
 0x31c   :  { %542 = dma.vmem_to_hbm [thread:$0]  %s540_s18, 128, %s1017_s8, [#allocation4]  }
 0x31d   :  { %849 = dma.done.wait [#allocation4], 128  }
 0x31e   :  { %850 = vsyncadd [#allocation4], 4294967168 }
 0x31f   :  { %546 = vsyncpa [#allocation3], 1 }
 0x320   :  { %547 = vsyncpa [#allocation6], 1 }
 0x321   :  { %548 = vsyncpa [#allocation9], 1 }
 0x322   :  { %549 = vsyncpa [#allocation4], 1 }

</bundles_post_ra>
